<compile_context>
chip_gen: v5e
topology: v5e:2x2
jax: 0.10.0
libtpu: 0.0.40
codegen_flags: <defaults>
</compile_context>

<pallas_src>
import functools

import jax
import jax.numpy as jnp
from jax import lax
from jax.experimental import pallas as pl
from jax.experimental.pallas import tpu as pltpu


Z_DIM = 640       # z_dim for res12/wrn28
NUM_CLS = 64      # default num_cls -> scale_factor = 2 (outdim <= 200)
ROT_DIM = 4
SCALE_FACTOR = 2.0
TN = 128          # batch tile: saturates MXU rows on v5e, safe vreg/VMEM budget on all gens


def _pre_kernel(x_ref, w_ref, b_ref, out_ref, *, num_cls):
    """One batch tile of forward_pretrain (fused classifier + rot head).

    x_ref  : (TN, Z)   embedding tile (f32 or bf16)
    w_ref  : (Z, P)    fused weight: [:, :C) = SCALE*g/||v|| * v.T,
                       [:, C:C+4) = rot_fc.weight.T, rest zero-padded
    b_ref  : (1, P)    fused bias: zeros except the rot columns
    out_ref: (TN, P)   lane-dense fused output = [logits | rot | pad]
    """
    x = x_ref[...]
    xf = x.astype(jnp.float32)

    # Per-row L2 norm in f32; reciprocal goes to the EUP slot (approx).
    x_norm = jnp.sqrt(jnp.sum(xf * xf, axis=1, keepdims=True))        # (TN, 1)
    inv = pl.reciprocal(x_norm + 1e-5, approx=True)                   # (TN, 1)

    # Single lane-packed MXU matmul for both heads, f32 accumulation.
    y = jnp.dot(x, w_ref[...], preferred_element_type=jnp.float32)    # (TN, P)

    # Row-scale only the classifier columns (scaling commutes with the dot);
    # rot columns get the bias instead (bias is zero on classifier columns).
    col = lax.broadcasted_iota(jnp.int32, (1, y.shape[1]), 1)          # (1, P)
    out_ref[...] = y * jnp.where(col < num_cls, inv, 1.0) + b_ref[...]


def forward_pretrain(x, v, g, w_rot, b_rot, *, tn=TN, matmul_dtype=jnp.float32):
    """x: (N, Z) f32 embedding. v: (C, Z) distLinear weight_v. g: (C,) weight_g.
    w_rot: (4, Z). b_rot: (4,). Returns (logits (N, C), rot (N, 4)) in f32."""
    N, Z = x.shape
    C = v.shape[0]
    R = w_rot.shape[0]

    # ---- one-time parameter folding (outside the grid loop) ----
    v_norm = jnp.sqrt(jnp.sum(v * v, axis=1, keepdims=True))           # (C, 1)
    w_cls = (SCALE_FACTOR * g[:, None] / v_norm) * v                   # (C, Z)

    P = max(128, pl.cdiv(C + R, 128) * 128)                            # lane-dense width
    w_cat = jnp.zeros((Z, P), jnp.float32)
    w_cat = w_cat.at[:, :C].set(w_cls.T)
    w_cat = w_cat.at[:, C:C + R].set(w_rot.T)
    b_cat = jnp.zeros((1, P), jnp.float32).at[0, C:C + R].set(b_rot)

    # ---- pad batch to a multiple of the tile (masked tail handled by slicing) ----
    n_pad = pl.cdiv(N, tn) * tn
    x_in = x if n_pad == N else jnp.pad(x, ((0, n_pad - N), (0, 0)))

    x_in = x_in.astype(matmul_dtype)
    w_in = w_cat.astype(matmul_dtype)

    out = pl.pallas_call(
        functools.partial(_pre_kernel, num_cls=C),
        out_shape=jax.ShapeDtypeStruct((n_pad, P), jnp.float32),
        grid_spec=pltpu.PrefetchScalarGridSpec(
            num_scalar_prefetch=0,
            grid=(n_pad // tn,),
            in_specs=[
                pl.BlockSpec((tn, Z), lambda i: (i, 0)),    # x tile (pipelined)
                pl.BlockSpec((Z, P), lambda i: (0, 0)),     # fused weight (resident)
                pl.BlockSpec((1, P), lambda i: (0, 0)),     # fused bias (resident)
            ],
            out_specs=pl.BlockSpec((tn, P), lambda i: (i, 0)),
        ),
        compiler_params=pltpu.CompilerParams(
            dimension_semantics=("parallel",),
        ),
    )(x_in, w_in, b_cat)

    logits = out[:N, :C]
    rot = out[:N, C:C + R]
    return logits, rot


def _reference(x, v, g, w_rot, b_rot):
    """Plain-JAX reference mirroring the PyTorch semantics."""
    x_norm = jnp.linalg.norm(x, axis=1, keepdims=True)
    x_normalized = x / (x_norm + 1e-5)
    v_norm = jnp.linalg.norm(v, axis=1, keepdims=True)                  # (C, 1)
    w_eff = g[:, None] * v / v_norm                                     # (C, Z)
    logits = SCALE_FACTOR * (x_normalized @ w_eff.T)
    rot = x @ w_rot.T + b_rot
    return logits, rot


if __name__ == "__main__":
    key = jax.random.PRNGKey(0)
    k_x, k_v, k_wr, k_br = jax.random.split(key, 4)

    N = 20                                     # small batch, not a tile multiple (exercises padding)
    x = jax.random.normal(k_x, (N, Z_DIM), dtype=jnp.float32)

    # distLinear params (weight-norm parameterization v, g)
    v = jax.random.normal(k_v, (NUM_CLS, Z_DIM), dtype=jnp.float32) * 0.05
    g = jnp.linalg.norm(v, axis=1)             # PyTorch weight_norm init: g = ||v||

    # rot_fc params
    w_rot = jax.random.normal(k_wr, (ROT_DIM, Z_DIM), dtype=jnp.float32) * 0.02
    b_rot = jax.random.normal(k_br, (ROT_DIM,), dtype=jnp.float32) * 0.01

    ref_logits, ref_rot = _reference(x, v, g, w_rot, b_rot)

    # f32-operand path (exact semantics up to the approx EUP reciprocal)
    logits, rot = forward_pretrain(x, v, g, w_rot, b_rot)
    jax.block_until_ready((logits, rot))
    assert logits.shape == (N, NUM_CLS) and rot.shape == (N, ROT_DIM)
    assert jnp.allclose(logits, ref_logits, atol=5e-3, rtol=5e-3)
    assert jnp.allclose(rot, ref_rot, atol=1e-3, rtol=1e-3)

    # bf16 MXU-operand path (v6e/v7x fast path; f32 accumulation, f32 norm math)
    logits_bf, rot_bf = forward_pretrain(
        x, v, g, w_rot, b_rot, matmul_dtype=jnp.bfloat16)
    jax.block_until_ready((logits_bf, rot_bf))
    assert jnp.allclose(logits_bf, ref_logits, atol=5e-2, rtol=5e-2)
    assert jnp.allclose(rot_bf, ref_rot, atol=5e-2, rtol=5e-2)

    print("KERNEL_OK")
</pallas_src>

<mosaic_0001>
module attributes {stable_mosaic.version = 11 : i64} {
  func.func @_pre_kernel(%arg0: i32, %arg1: memref<128x640xf32, #tpu.memory_space<vmem>>, %arg2: memref<640x128xf32, #tpu.memory_space<vmem>>, %arg3: memref<1x128xf32, #tpu.memory_space<vmem>>, %arg4: memref<128x128xf32, #tpu.memory_space<vmem>>) attributes {dimension_semantics = [#tpu.dimension_semantics<parallel>], iteration_bounds = array<i64: 1>, scalar_prefetch = 0 : i64, scratch_operands = 0 : i64, tpu.core_type = #tpu.core_type<tc>, window_params = [{transform_indices = @transform_0, window_bounds = array<i64: 128, 640>}, {pipeline_mode = #tpu.pipeline_mode<synchronous>, transform_indices = @transform_1, window_bounds = array<i64: 640, 128>}, {pipeline_mode = #tpu.pipeline_mode<synchronous>, transform_indices = @transform_2, window_bounds = array<i64: 1, 128>}, {transform_indices = @transform_3, window_bounds = array<i64: 128, 128>}]} {
    %c0 = arith.constant 0 : index
    %c0_0 = arith.constant 0 : index
    %0 = vector.load %arg1[%c0, %c0_0] : memref<128x640xf32, #tpu.memory_space<vmem>>, vector<128x640xf32>
    %1 = arith.mulf %0, %0 : vector<128x640xf32>
    %cst = arith.constant dense<0.000000e+00> : vector<128xf32>
    %2 = vector.multi_reduction <add>, %1, %cst [1] : vector<128x640xf32> to vector<128xf32>
    %3 = vector.shape_cast %2 : vector<128xf32> to vector<128x1xf32>
    %4 = math.sqrt %3 : vector<128x1xf32>
    %cst_1 = arith.constant 9.99999974E-6 : f32
    %5 = vector.broadcast %cst_1 : f32 to vector<128x1xf32>
    %6 = arith.addf %4, %5 : vector<128x1xf32>
    %7 = tpu.reciprocal %6 {approx = true} : vector<128x1xf32> -> vector<128x1xf32>
    %c0_2 = arith.constant 0 : index
    %c0_3 = arith.constant 0 : index
    %8 = vector.load %arg2[%c0_2, %c0_3] : memref<640x128xf32, #tpu.memory_space<vmem>>, vector<640x128xf32>
    %cst_4 = arith.constant dense<0.000000e+00> : vector<128x128xf32>
    %9 = tpu.matmul %0, %8, %cst_4 {dimension_numbers = #tpu.dot_dimension_numbers<[1], [0], [0], [1], [0, 0, 1, 1], [], []>} : vector<128x640xf32>, vector<640x128xf32>, vector<128x128xf32> -> vector<128x128xf32>
    %10 = tpu.iota {dimensions = array<i32: 1>} : vector<1x128xi32>
    %c64_i32 = arith.constant 64 : i32
    %11 = vector.broadcast %c64_i32 : i32 to vector<1x128xi32>
    %12 = arith.cmpi slt, %10, %11 : vector<1x128xi32>
    %cst_5 = arith.constant 1.000000e+00 : f32
    %13 = vector.shape_cast %12 : vector<1x128xi1> to vector<1x128xi1>
    %14 = vector.broadcast %13 : vector<1x128xi1> to vector<128x128xi1>
    %15 = vector.shape_cast %7 : vector<128x1xf32> to vector<128x1xf32>
    %16 = vector.broadcast %15 : vector<128x1xf32> to vector<128x128xf32>
    %17 = vector.broadcast %cst_5 : f32 to vector<128x128xf32>
    %18 = arith.select %14, %16, %17 : vector<128x128xi1>, vector<128x128xf32>
    %19 = arith.mulf %9, %18 : vector<128x128xf32>
    %c0_6 = arith.constant 0 : index
    %c0_7 = arith.constant 0 : index
    %20 = vector.load %arg3[%c0_6, %c0_7] : memref<1x128xf32, #tpu.memory_space<vmem>>, vector<1x128xf32>
    %21 = vector.broadcast %20 : vector<1x128xf32> to vector<128x128xf32>
    %22 = arith.addf %19, %21 : vector<128x128xf32>
    %c0_8 = arith.constant 0 : index
    %c0_9 = arith.constant 0 : index
    %23 = vector.load %arg4[%c0_8, %c0_9] : memref<128x128xf32, #tpu.memory_space<vmem>>, vector<128x128xf32>
    tpu.vector_store %arg4[%c0_8, %c0_9], %22 {strides = array<i32>} : memref<128x128xf32, #tpu.memory_space<vmem>>, vector<128x128xf32>,
    return
  }
  func.func @transform_0(%arg0: i32) -> (i32, i32) {
    %c0_i32 = arith.constant 0 : i32
    %c0_i32_0 = arith.constant 0 : i32
    return %arg0, %c0_i32 : i32, i32
  }
  func.func @transform_1(%arg0: i32) -> (i32, i32) {
    %c0_i32 = arith.constant 0 : i32
    %c0_i32_0 = arith.constant 0 : i32
    %c0_i32_1 = arith.constant 0 : i32
    return %c0_i32, %c0_i32_0 : i32, i32
  }
  func.func @transform_2(%arg0: i32) -> (i32, i32) {
    %c0_i32 = arith.constant 0 : i32
    %c0_i32_0 = arith.constant 0 : i32
    %c0_i32_1 = arith.constant 0 : i32
    return %c0_i32, %c0_i32_0 : i32, i32
  }
  func.func @transform_3(%arg0: i32) -> (i32, i32) {
    %c0_i32 = arith.constant 0 : i32
    %c0_i32_0 = arith.constant 0 : i32
    return %arg0, %c0_i32 : i32, i32
  }
}

</mosaic_0001>

<bundles_post_ra>
// kernel: tpu_custom_call.1
= control target key start
LH: loop header
LB: loop body
LE: loop exit
PB: predicated region body
PF: predicated region fallthrough
CT: control target
= control target key end

     0   :  { %8 = vsyncpa [#allocation3], 0  ;;  %s1950_s0 = inlined_call_operand.hbm [shape: f32[128,640], index: 0, kind: input, shape index: {}]   ;;  %s1951_s1 = inlined_call_operand.hbm [shape: f32[640,128], index: 1, kind: input, shape index: {}]   ;;  %s1952_s2 = inlined_call_operand.vmem [shape: f32[1,128], index: 2, kind: input, shape index: {}]   ;;  %s1953_s3 = inlined_call_operand.hbm [shape: f32[128,128], index: 3, kind: output, shape index: {}]  }
   0x1   :  { %9 = vsyncpa [#allocation6], 0 }
   0x2   :  { %10 = vsyncpa [#allocation4], 0  ;;  %s15_s14 = sshll.u32 %s1950_s0, 4  ;;  %s1223_s15 = smov [#allocation2]   ;;  %s16_s14 = int_to_ptr.hbm [resolvable:$true] %s15_s14 }
   0x3   :  { %s17_s16 = sshll.u32 %s1223_s15, 4  ;;  %s28_s19 = sshll.u32 %s1951_s1, 4  ;;  %s18_s16 = int_to_ptr.vmem [resolvable:$true] %s17_s16  ;;  %s29_s19 = int_to_ptr.hbm [resolvable:$true] %s28_s19 }
   0x4   :  { %s1224_s20 = smov 640   ;;  %s1225_s21 = smov 40  }
   0x5   :  { %23 = dma.hbm_to_vmem [thread:$0]  %s16_s14, 10240, %s18_s16, [#allocation3], %s1224_s20, %s1224_s20, %s1225_s21  }
   0x6   :  { %s1226_s22 = smov [#allocation5]   ;;  %s1227_s24 = smov 128  }
   0x7   :  { %s30_s23 = sshll.u32 %s1226_s22, 4  ;;  %s1228_s25 = smov 8   ;;  %s31_s23 = int_to_ptr.vmem [resolvable:$true] %s30_s23 }
   0x8   :  { %36 = dma.hbm_to_vmem [thread:$0]  %s29_s19, 10240, %s31_s23, [#allocation6], %s1227_s24, %s1227_s24, %s1228_s25  }
   0x9   :  { %1217 = dma.done.wait [#allocation3], 10240  }
   0xa   :  { %1218 = vsyncadd [#allocation3], 4294957056 }
   0xb   :  { %1219 = dma.done.wait [#allocation6], 10240  }
   0xc   :  { %1220 = vsyncadd [#allocation6], 4294957056  ;;  %v542_v0 = vld [vmem:[#allocation5 + $0x78] sm:$0xff]  ;;  %v541_v1 = vld [vmem:[#allocation5 + $0x70] sm:$0xff]  ;;  %s1011_s29 = sshll.u32 %s1953_s3, 4  ;;  %s1012_s29 = int_to_ptr.hbm [resolvable:$true] %s1011_s29 }
   0xd   :  { %1025 = vmatpush.msra.mxu1 %v542_v0  ;;  %1026 = vmatpush.msra.mxu2 %v542_v0  ;;  %v540_v2 = vld [vmem:[#allocation5 + $0x68] sm:$0xff]  ;;  %v539_v3 = vld [vmem:[#allocation5 + $0x60] sm:$0xff]  ;;  %v538_v4 = vld [vmem:[#allocation5 + $0x58] sm:$0xff] }
   0xe   :  { %1027 = vmatpush.msra.mxu3 %v542_v0  ;;  %607 = vmatpush.msra.mxu0 %v542_v0  ;;  %v537_v5 = vld [vmem:[#allocation5 + $0x50] sm:$0xff]  ;;  %v536_v6 = vld [vmem:[#allocation5 + $0x48] sm:$0xff]  ;;  %v535_v7 = vld [vmem:[#allocation5 + $0x40] sm:$0xff] }
   0xf   :  { %1028 = vmatpush.msra.mxu1 %v541_v1  ;;  %1029 = vmatpush.msra.mxu2 %v541_v1  ;;  %v534_v8 = vld [vmem:[#allocation5 + $0x38] sm:$0xff]  ;;  %v533_v9 = vld [vmem:[#allocation5 + $0x30] sm:$0xff]  ;;  %v532_v10 = vld [vmem:[#allocation5 + $0x28] sm:$0xff] }
  0x10   :  { %1030 = vmatpush.msra.mxu3 %v541_v1  ;;  %608 = vmatpush.msra.mxu0 %v541_v1  ;;  %v531_v11 = vld [vmem:[#allocation5 + $0x20] sm:$0xff]  ;;  %v530_v12 = vld [vmem:[#allocation5 + $0x18] sm:$0xff]  ;;  %v529_v13 = vld [vmem:[#allocation5 + $0x10] sm:$0xff] }
  0x11   :  { %1031 = vmatpush.msra.mxu1 %v540_v2  ;;  %1032 = vmatpush.msra.mxu2 %v540_v2  ;;  %v528_v14 = vld [vmem:[#allocation5 + $0x8] sm:$0xff]  ;;  %v527_v15 = vld [vmem:[#allocation5] sm:$0xff]  ;;  %v574_v18 = vld [vmem:[#allocation5 + $0x178] sm:$0xff] }
  0x12   :  { %1033 = vmatpush.msra.mxu3 %v540_v2  ;;  %609 = vmatpush.msra.mxu0 %v540_v2  ;;  %v1259_v16 = vld [vmem:[#allocation2 + $0xa0] sm:$0xff]  ;;  %v558_v19 = vld [vmem:[#allocation5 + $0xf8] sm:$0xff]  ;;  %v573_v21 = vld [vmem:[#allocation5 + $0x170] sm:$0xff] }
  0x13   :  { %1034 = vmatpush.msra.mxu1 %v539_v3  ;;  %1035 = vmatpush.msra.mxu2 %v539_v3  ;;  %v1261_v17 = vld [vmem:[#allocation2 + $0x140] sm:$0xff]  ;;  %v590_v22 = vld [vmem:[#allocation5 + $0x1f8] sm:$0xff]  ;;  %v557_v23 = vld [vmem:[#allocation5 + $0xf0] sm:$0xff] }
  0x14   :  { %1036 = vmatpush.msra.mxu3 %v539_v3  ;;  %610 = vmatpush.msra.mxu0 %v539_v3  ;;  %v1263_v20 = vld [vmem:[#allocation2 + $0x1e0] sm:$0xff]  ;;  %v572_v24 = vld [vmem:[#allocation5 + $0x168] sm:$0xff]  ;;  %v589_v25 = vld [vmem:[#allocation5 + $0x1f0] sm:$0xff] }
  0x15   :  { %1037 = vmatpush.msra.mxu1 %v538_v4  ;;  %1038 = vmatpush.msra.mxu2 %v538_v4  ;;  %v556_v26 = vld [vmem:[#allocation5 + $0xe8] sm:$0xff]  ;;  %v47_v27 = vld [vmem:[#allocation2] sm:$0xff]  ;;  %v570_v34 = vld [vmem:[#allocation5 + $0x158] sm:$0xff] }
  0x16   :  { %1039 = vmatpush.msra.mxu3 %v538_v4  ;;  %611 = vmatpush.msra.mxu0 %v538_v4  ;;  %v571_v28 = vld [vmem:[#allocation5 + $0x160] sm:$0xff]  ;;  %v588_v29 = vld [vmem:[#allocation5 + $0x1e8] sm:$0xff]  ;;  %v554_v36 = vld [vmem:[#allocation5 + $0xd8] sm:$0xff]  ;;  %v127_v37 = vmul.f32 %v47_v27, %v47_v27 }
  0x17   :  { %1040 = vmatpush.msra.mxu1 %v537_v5  ;;  %1041 = vmatpush.msra.mxu2 %v537_v5  ;;  %v1268_v30 = vld [vmem:[#allocation2 + $0x8] sm:$0xff]  ;;  %v555_v31 = vld [vmem:[#allocation5 + $0xe0] sm:$0xff]  ;;  %v569_v40 = vld [vmem:[#allocation5 + $0x150] sm:$0xff] }
  0x18   :  { %1042 = vmatpush.msra.mxu3 %v537_v5  ;;  %612 = vmatpush.msra.mxu0 %v537_v5  ;;  %v1270_v32 = vld [vmem:[#allocation2 + $0x168] sm:$0xff]  ;;  %v587_v35 = vld [vmem:[#allocation5 + $0x1e0] sm:$0xff]  ;;  %v128_v38 = vmul.f32 %v1268_v30, %v1268_v30  ;;  %v1279_v41 = vld [vmem:[#allocation2 + $0x10] sm:$0xff] }
  0x19   :  { %1043 = vmatpush.msra.mxu1 %v536_v6  ;;  %1044 = vmatpush.msra.mxu2 %v536_v6  ;;  %v1272_v33 = vld [vmem:[#allocation2 + $0xc8] sm:$0xff]  ;;  %v586_v42 = vld [vmem:[#allocation5 + $0x1d8] sm:$0xff]  ;;  %v553_v44 = vld [vmem:[#allocation5 + $0xd0] sm:$0xff]  ;;  %v129_v49 = vmul.f32 %v1279_v41, %v1279_v41 }
  0x1a   :  { %1045 = vmatpush.msra.mxu3 %v536_v6  ;;  %613 = vmatpush.msra.mxu0 %v536_v6  ;;  %v1277_v39 = vld [vmem:[#allocation2 + $0x208] sm:$0xff]  ;;  %v606_v43 = vld [vmem:[#allocation5 + $0x278] sm:$0xff]  ;;  %v207_v46 = vadd.f32 %v128_v38, %v127_v37  ;;  %v585_v47 = vld [vmem:[#allocation5 + $0x1d0] sm:$0xff] }
  0x1b   :  { %1046 = vmatpush.msra.mxu1 %v535_v7  ;;  %1047 = vmatpush.msra.mxu2 %v535_v7  ;;  %v568_v45 = vld [vmem:[#allocation5 + $0x148] sm:$0xff]  ;;  %v605_v48 = vld [vmem:[#allocation5 + $0x270] sm:$0xff]  ;;  %v567_v51 = vld [vmem:[#allocation5 + $0x140] sm:$0xff] }
  0x1c   :  { %1048 = vmatpush.msra.mxu3 %v535_v7  ;;  %614 = vmatpush.msra.mxu0 %v535_v7  ;;  %v552_v50 = vld [vmem:[#allocation5 + $0xc8] sm:$0xff]  ;;  %v1285_v52 = vld [vmem:[#allocation2 + $0x18] sm:$0xff]  ;;  %v551_v55 = vld [vmem:[#allocation5 + $0xc0] sm:$0xff]  ;;  %v208_v61 = vadd.f32 %v207_v46, %v129_v49 }
  0x1d   :  { %1049 = vmatpush.msra.mxu1 %v534_v8  ;;  %1050 = vmatpush.msra.mxu2 %v534_v8  ;;  %v584_v53 = vld [vmem:[#allocation5 + $0x1c8] sm:$0xff]  ;;  %v1287_v56 = vld [vmem:[#allocation2 + $0x190] sm:$0xff]  ;;  %v566_v58 = vld [vmem:[#allocation5 + $0x138] sm:$0xff]  ;;  %v130_v60 = vmul.f32 %v1285_v52, %v1285_v52 }
  0x1e   :  { %1051 = vmatpush.msra.mxu3 %v534_v8  ;;  %615 = vmatpush.msra.mxu0 %v534_v8  ;;  %v604_v54 = vld [vmem:[#allocation5 + $0x268] sm:$0xff]  ;;  %v1289_v57 = vld [vmem:[#allocation2 + $0xf0] sm:$0xff]  ;;  %v583_v63 = vld [vmem:[#allocation5 + $0x1c0] sm:$0xff] }
  0x1f   :  { %1052 = vmatpush.msra.mxu1 %v533_v9  ;;  %1053 = vmatpush.msra.mxu2 %v533_v9  ;;  %v1291_v59 = vld [vmem:[#allocation2 + $0x30] sm:$0xff]  ;;  %v1295_v62 = vld [vmem:[#allocation2 + $0xa8] sm:$0xff]  ;;  %v603_v0 = vld [vmem:[#allocation5 + $0x260] sm:$0xff] }
  0x20   :  { %1054 = vmatpush.msra.mxu3 %v533_v9  ;;  %616 = vmatpush.msra.mxu0 %v533_v9  ;;  %v1297_v1 = vld [vmem:[#allocation2 + $0x20] sm:$0xff]  ;;  %v550_v2 = vld [vmem:[#allocation5 + $0xb8] sm:$0xff]  ;;  %v52_v3 = vld [vmem:[#allocation2 + $0x28] sm:$0xff]  ;;  %v133_v6 = vmul.f32 %v1291_v59, %v1291_v59 }
  0x21   :  { %1055 = vmatpush.msra.mxu1 %v532_v10  ;;  %1056 = vmatpush.msra.mxu2 %v532_v10  ;;  %v1300_v4 = vld [vmem:[#allocation2 + $0x58] sm:$0xff]  ;;  %v132_v5 = vmul.f32 %v52_v3, %v52_v3  ;;  %v1305_v7 = vld [vmem:[#allocation2 + $0x230] sm:$0xff]  ;;  %v1328_v37 = vld [vmem:[#allocation2 + $0x40] sm:$0xff] }
  0x22   :  { %1057 = vmatpush.msra.mxu3 %v532_v10  ;;  %617 = vmatpush.msra.mxu0 %v532_v10  ;;  %v565_v8 = vld [vmem:[#allocation5 + $0x130] sm:$0xff]  ;;  %v582_v9 = vld [vmem:[#allocation5 + $0x1b8] sm:$0xff]  ;;  %v547_v38 = vld [vmem:[#allocation5 + $0xa0] sm:$0xff] }
  0x23   :  { %1058 = vmatpush.msra.mxu1 %v531_v11  ;;  %1059 = vmatpush.msra.mxu2 %v531_v11  ;;  %v602_v10 = vld [vmem:[#allocation5 + $0x258] sm:$0xff]  ;;  %v1336_v46 = vld [vmem:[#allocation2 + $0xd0] sm:$0xff]  ;;  %v1340_v49 = vld [vmem:[#allocation2 + $0x80] sm:$0xff] }
  0x24   :  { %1060 = vmatpush.msra.mxu3 %v531_v11  ;;  %618 = vmatpush.msra.mxu0 %v531_v11  ;;  %v131_v11 = vmul.f32 %v1297_v1, %v1297_v1 }
  0x25   :  { %1061 = vmatpush.msra.mxu1 %v530_v12  ;;  %1062 = vmatpush.msra.mxu2 %v530_v12 }
  0x26   :  { %1063 = vmatpush.msra.mxu3 %v530_v12  ;;  %619 = vmatpush.msra.mxu0 %v530_v12  ;;  %v209_v12 = vadd.f32 %v208_v61, %v130_v60  ;;  %v546_v60 = vld [vmem:[#allocation5 + $0x98] sm:$0xff]  ;;  %v1348_v61 = vld [vmem:[#allocation2 + $0x48] sm:$0xff] }
  0x27   :  { %1064 = vmatpush.msra.mxu1 %v529_v13  ;;  %1065 = vmatpush.msra.mxu2 %v529_v13 }
  0x28   :  { %1066 = vmatpush.msra.mxu3 %v529_v13  ;;  %620 = vmatpush.msra.mxu0 %v529_v13  ;;  %v1309_v13 = vld [vmem:[#allocation2 + $0x50] sm:$0xff] }
  0x29   :  { %1067 = vmatpush.msra.mxu1 %v528_v14  ;;  %1068 = vmatpush.msra.mxu2 %v528_v14 }
  0x2a   :  { %1069 = vmatpush.msra.mxu3 %v528_v14  ;;  %621 = vmatpush.msra.mxu0 %v528_v14  ;;  %v1311_v14 = vld [vmem:[#allocation2 + $0x38] sm:$0xff] }
  0x2b   :  { %1070 = vmatpush.msra.mxu1 %v527_v15  ;;  %1071 = vmatpush.msra.mxu2 %v527_v15 }
  0x2c   :  { %635 = vmatmul.f32.vlgmr.msra.gmra.mxu1 %v1259_v16  ;;  %647 = vmatmul.f32.vlgmr.msra.gmra.mxu2 %v1261_v17 }
  0x2d   :  { %737 = vmatpush.msrb.mxu2 %v574_v18  ;;  %1072 = vmatpush.msra.mxu3 %v527_v15  ;;  %v564_v18 = vld [vmem:[#allocation5 + $0x128] sm:$0xff] }
  0x2e   :  { %672 = vmatpush.msrb.mxu1 %v558_v19  ;;  %659 = vmatmul.f32.vlgmr.msra.gmra.mxu3 %v1263_v20  ;;  %v137_v19 = vmul.f32 %v1309_v13, %v1309_v13 }
  0x2f   :  { %738 = vmatpush.msrb.mxu2 %v573_v21  ;;  %802 = vmatpush.msrb.mxu3 %v590_v22  ;;  %v138_v21 = vmul.f32 %v1300_v4, %v1300_v4  ;;  %v147_v22 = vmul.f32 %v1259_v16, %v1259_v16  ;;  %v580_v16 = vld [vmem:[#allocation5 + $0x1a8] sm:$0xff] }
  0x30   :  { %673 = vmatpush.msrb.mxu1 %v557_v23  ;;  %622 = vmatpush.msra.mxu0 %v527_v15  ;;  %v549_v15 = vld [vmem:[#allocation5 + $0xb0] sm:$0xff]  ;;  %v148_v23 = vmul.f32 %v1295_v62, %v1295_v62 }
  0x31   :  { %739 = vmatpush.msrb.mxu2 %v572_v24  ;;  %803 = vmatpush.msrb.mxu3 %v589_v25  ;;  %v581_v24 = vld [vmem:[#allocation5 + $0x1b0] sm:$0xff] }
  0x32   :  { %674 = vmatpush.msrb.mxu1 %v556_v26  ;;  %623 = vmatmul.f32.vlgmr.msra.gmra.mxu0 %v47_v27  ;;  %v601_v25 = vld [vmem:[#allocation5 + $0x250] sm:$0xff]  ;;  %v1322_v26 = vld [vmem:[#allocation2 + $0x60] sm:$0xff]  ;;  %v213_v27 = vadd.f32 %v133_v6, %v132_v5 }
  0x33   :  { %740 = vmatpush.msrb.mxu2 %v571_v28  ;;  %804 = vmatpush.msrb.mxu3 %v588_v29  ;;  %v548_v28 = vld [vmem:[#allocation5 + $0xa8] sm:$0xff]  ;;  %v563_v29 = vld [vmem:[#allocation5 + $0x120] sm:$0xff]  ;;  %v561_v5 = vld [vmem:[#allocation5 + $0x110] sm:$0xff] }
  0x34   :  { %675 = vmatpush.msrb.mxu1 %v555_v31  ;;  %650 = vmatmul.f32.gmra.mxu2 %v1270_v32  ;;  %v134_v31 = vmul.f32 %v1311_v14, %v1311_v14 }
  0x35   :  { %638 = vmatmul.f32.gmra.mxu1 %v1272_v33  ;;  %741 = vmatpush.msrb.mxu2 %v570_v34  ;;  %v1326_v34 = vld [vmem:[#allocation2 + $0xb0] sm:$0xff] }
  0x36   :  { %805 = vmatpush.msrb.mxu3 %v587_v35  ;;  %676 = vmatpush.msrb.mxu1 %v554_v36  ;;  %v600_v35 = vld [vmem:[#allocation5 + $0x248] sm:$0xff]  ;;  %v210_v36 = vadd.f32 %v209_v12, %v131_v11  ;;  %v578_v11 = vld [vmem:[#allocation5 + $0x198] sm:$0xff] }
  0x37   :  { %662 = vmatmul.f32.gmra.mxu3 %v1277_v39  ;;  %742 = vmatpush.msrb.mxu2 %v569_v40  ;;  %v1330_v40 = vld [vmem:[#allocation2 + $0x118] sm:$0xff] }
  0x38   :  { %806 = vmatpush.msrb.mxu3 %v586_v42  ;;  %867 = vmatpush.msrb.mxu0 %v606_v43  ;;  %v219_v42 = vadd.f32 %v138_v21, %v137_v19  ;;  %v1332_v43 = vld [vmem:[#allocation2 + $0x68] sm:$0xff]  ;;  %v598_v12 = vld [vmem:[#allocation5 + $0x238] sm:$0xff]  ;;  %v153_v21 = vmul.f32 %v1336_v46, %v1336_v46 }
  0x39   :  { %677 = vmatpush.msrb.mxu1 %v553_v44  ;;  %743 = vmatpush.msrb.mxu2 %v568_v45  ;;  %v139_v44 = vmul.f32 %v1322_v26, %v1322_v26  ;;  %v231_v45 = vadd.f32 %v148_v23, %v147_v22  ;;  %v545_v22 = vld [vmem:[#allocation5 + $0x90] sm:$0xff]  ;;  %v136_v23 = vmul.f32 %v1348_v61, %v1348_v61 }
  0x3a   :  { %807 = vmatpush.msrb.mxu3 %v585_v47  ;;  %868 = vmatpush.msrb.mxu0 %v605_v48  ;;  %v1338_v47 = vld [vmem:[#allocation2 + $0x1b8] sm:$0xff] }
  0x3b   :  { %678 = vmatpush.msrb.mxu1 %v552_v50  ;;  %744 = vmatpush.msrb.mxu2 %v567_v51  ;;  %v562_v48 = vld [vmem:[#allocation5 + $0x118] sm:$0xff]  ;;  %v149_v50 = vmul.f32 %v1326_v34, %v1326_v34  ;;  %v579_v51 = vld [vmem:[#allocation5 + $0x1a0] sm:$0xff] }
  0x3c   :  { %808 = vmatpush.msrb.mxu3 %v584_v53  ;;  %869 = vmatpush.msrb.mxu0 %v604_v54  ;;  %v599_v53 = vld [vmem:[#allocation5 + $0x240] sm:$0xff]  ;;  %v135_v54 = vmul.f32 %v1328_v37, %v1328_v37 }
  0x3d   :  { %679 = vmatpush.msrb.mxu1 %v551_v55  ;;  %653 = vmatmul.f32.gmra.mxu2 %v1287_v56  ;;  %v214_v55 = vadd.f32 %v213_v27, %v134_v31  ;;  %v232_v19 = vadd.f32 %v231_v45, %v149_v50  ;;  %v157_v27 = vmul.f32 %v1289_v57, %v1289_v57  ;;  %v577_v31 = vld [vmem:[#allocation5 + $0x190] sm:$0xff]  ;;  %v576_v45 = vld [vmem:[#allocation5 + $0x188] sm:$0xff] }
  0x3e   :  { %641 = vmatmul.f32.gmra.mxu1 %v1289_v57  ;;  %745 = vmatpush.msrb.mxu2 %v566_v58  ;;  %v1346_v58 = vld [vmem:[#allocation2 + $0xb8] sm:$0xff] }
  0x3f   :  { %809 = vmatpush.msrb.mxu3 %v583_v63  ;;  %870 = vmatpush.msrb.mxu0 %v603_v0  ;;  %v1350_v63 = vld [vmem:[#allocation2 + $0x78] sm:$0xff]  ;;  %v140_v0 = vmul.f32 %v1332_v43, %v1332_v43 }
  0x40   :  { %680 = vmatpush.msrb.mxu1 %v550_v2  ;;  %626 = vmatmul.f32.gmra.mxu0 %v52_v3  ;;  %v1354_v2 = vld [vmem:[#allocation2 + $0xf8] sm:$0xff]  ;;  %v142_v6 = vmul.f32 %v1350_v63, %v1350_v63 }
  0x41   :  { %665 = vmatmul.f32.gmra.mxu3 %v1305_v7  ;;  %746 = vmatpush.msrb.mxu2 %v565_v8  ;;  %v1358_v3 = vld [vmem:[#allocation2 + $0x258] sm:$0xff]  ;;  %v143_v8 = vmul.f32 %v1340_v49, %v1340_v49 }
  0x42   :  { %810 = vmatpush.msrb.mxu3 %v582_v9  ;;  %871 = vmatpush.msrb.mxu0 %v602_v10  ;;  %v220_v9 = vadd.f32 %v219_v42, %v139_v44  ;;  %v152_v10 = vmul.f32 %v1272_v33, %v1272_v33  ;;  %v215_v33 = vadd.f32 %v214_v55, %v135_v54  ;;  %v559_v44 = vld [vmem:[#allocation5 + $0x100] sm:$0xff] }
  0x43   :  { %681 = vmatpush.msrb.mxu1 %v549_v15  ;;  %747 = vmatpush.msrb.mxu2 %v564_v18  ;;  %v1366_v15 = vld [vmem:[#allocation2 + $0x70] sm:$0xff]  ;;  %v150_v18 = vmul.f32 %v1346_v58, %v1346_v58  ;;  %v543_v54 = vld [vmem:[#allocation5 + $0x80] sm:$0xff] }
  0x44   :  { %811 = vmatpush.msrb.mxu3 %v581_v24  ;;  %872 = vmatpush.msrb.mxu0 %v601_v25  ;;  %v1374_v24 = vld [vmem:[#allocation2 + $0x88] sm:$0xff]  ;;  %v1376_v25 = vld [vmem:[#allocation2 + $0xc0] sm:$0xff]  ;;  %v141_v42 = vmul.f32 %v1366_v15, %v1366_v15  ;;  %v221_v57 = vadd.f32 %v220_v9, %v140_v0  ;;  %v216_v55 = vadd.f32 %v215_v33, %v136_v23 }
  0x45   :  { %682 = vmatpush.msrb.mxu1 %v548_v28  ;;  %748 = vmatpush.msrb.mxu2 %v563_v29  ;;  %v158_v28 = vmul.f32 %v1354_v2, %v1354_v2  ;;  %v560_v29 = vld [vmem:[#allocation5 + $0x108] sm:$0xff]  ;;  %v233_v50 = vadd.f32 %v232_v19, %v150_v18 }
  0x46   :  { %812 = vmatpush.msrb.mxu3 %v580_v16  ;;  %873 = vmatpush.msrb.mxu0 %v600_v35  ;;  %v1384_v16 = vld [vmem:[#allocation2 + $0xd8] sm:$0xff]  ;;  %v597_v35 = vld [vmem:[#allocation5 + $0x230] sm:$0xff]  ;;  %v222_v9 = vadd.f32 %v221_v57, %v141_v42  ;;  %v1407_v23 = vld [vmem:[#allocation2 + $0xe8] sm:$0xff] }
  0x47   :  { %683 = vmatpush.msrb.mxu1 %v547_v38  ;;  %211 = vadd.xlane.f32.xlu0 %v210_v36  ;;  %v544_v36 = vld [vmem:[#allocation5 + $0x88] sm:$0xff]  ;;  %v225_v38 = vadd.f32 %v143_v8, %v142_v6  ;;  %v154_v0 = vmul.f32 %v1384_v16, %v1384_v16  ;;  %v243_v6 = vadd.f32 %v158_v28, %v157_v27  ;;  %v575_v8 = vld [vmem:[#allocation5 + $0x180] sm:$0xff]  ;;  %v593_v42 = vld [vmem:[#allocation5 + $0x210] sm:$0xff] }
  0x48   :  { %644 = vmatmul.f32.gmra.mxu1 %v1330_v40  ;;  %656 = vmatmul.f32.gmra.mxu2 %v1338_v47  ;;  %v156_v57 = vmul.f32 %v1407_v23, %v1407_v23 }
  0x49   :  { %749 = vmatpush.msrb.mxu2 %v562_v48  ;;  %813 = vmatpush.msrb.mxu3 %v579_v51  ;;  %v151_v48 = vmul.f32 %v1376_v25, %v1376_v25  ;;  %v237_v51 = vadd.f32 %v153_v21, %v152_v10  ;;  %v1398_v10 = vld [vmem:[#allocation2 + $0x120] sm:$0xff] }
  0x4a   :  { %874 = vmatpush.msrb.mxu0 %v599_v53  ;;  %684 = vmatpush.msrb.mxu1 %v546_v60  ;;  %v596_v53 = vld [vmem:[#allocation5 + $0x228] sm:$0xff]  ;;  %v1392_v60 = vld [vmem:[#allocation2 + $0x90] sm:$0xff]  ;;  %v1402_v21 = vld [vmem:[#allocation2 + $0x100] sm:$0xff] }
  0x4b   :  { %629 = vmatmul.f32.gmra.mxu0 %v1309_v13  ;;  %668 = vmatmul.f32.gmra.mxu3 %v1358_v3  ;;  %v144_v13 = vmul.f32 %v1374_v24, %v1374_v24  ;;  %v234_v19 = vadd.f32 %v233_v50, %v151_v48  ;;  %v238_v27 = vadd.f32 %v237_v51, %v154_v0  ;;  %v592_v48 = vld [vmem:[#allocation5 + $0x208] sm:$0xff] }
  0x4c   :  { %750 = vmatpush.msrb.mxu2 %v561_v5  ;;  %814 = vmatpush.msrb.mxu3 %v578_v11  ;;  %v1396_v5 = vld [vmem:[#allocation2 + $0xe0] sm:$0xff]  ;;  %v159_v28 = vmul.f32 %v1402_v21, %v1402_v21  ;;  %v1432_v51 = vld [vmem:[#allocation2 + $0x148] sm:$0xff] }
  0x4d   :  { %875 = vmatpush.msrb.mxu0 %v598_v12  ;;  %685 = vmatpush.msrb.mxu1 %v545_v22  ;;  %v595_v11 = vld [vmem:[#allocation5 + $0x220] sm:$0xff]  ;;  %v145_v12 = vmul.f32 %v1392_v60, %v1392_v60  ;;  %v226_v18 = vadd.f32 %v225_v38, %v144_v13  ;;  %v1405_v22 = vld [vmem:[#allocation2 + $0x98] sm:$0xff]  ;;  %v155_v33 = vmul.f32 %v1396_v5, %v1396_v5 }
  0x4e   :  { %751 = vmatpush.msrb.mxu2 %v560_v29  ;;  %815 = vmatpush.msrb.mxu3 %v577_v31  ;;  %v162_v29 = vmul.f32 %v1330_v40, %v1330_v40  ;;  %v594_v31 = vld [vmem:[#allocation5 + $0x218] sm:$0xff]  ;;  %v244_v38 = vadd.f32 %v243_v6, %v159_v28  ;;  %v1456_v28 = vld [vmem:[#allocation2 + $0x150] sm:$0xff] }
  0x4f   :  { %876 = vmatpush.msrb.mxu0 %v597_v35  ;;  %686 = vmatpush.msrb.mxu1 %v544_v36  ;;  %v1416_v35 = vld [vmem:[#allocation2 + $0x108] sm:$0xff]  ;;  %v227_v40 = vadd.f32 %v226_v18, %v145_v12  ;;  %v1450_v18 = vld [vmem:[#allocation2 + $0x138] sm:$0xff] }
  0x50   :  { %752 = vmatpush.msrb.mxu2 %v559_v44  ;;  %816 = vmatpush.msrb.mxu3 %v576_v45  ;;  %v160_v36 = vmul.f32 %v1416_v35, %v1416_v35  ;;  %v1428_v44 = vld [vmem:[#allocation2 + $0x110] sm:$0xff] }
  0x51   :  { %877 = vmatpush.msrb.mxu0 %v596_v53  ;;  %687 = vmatpush.msrb.mxu1 %v543_v54  ;;  %v161_v45 = vmul.f32 %v1428_v44, %v1428_v44  ;;  %v591_v53 = vld [vmem:[#allocation5 + $0x200] sm:$0xff] }
  0x52   :  { %217 = vadd.xlane.f32.xlu0 %v216_v55  ;;  %688 = vmatmul.f32.vlgmr.msrb.gmra.mxu1 %v1268_v30  ;;  %v163_v30 = vmul.f32 %v1398_v10, %v1398_v10  ;;  %v245_v13 = vadd.f32 %v244_v38, %v160_v36  ;;  %v1434_v55 = vld [vmem:[#allocation2 + $0x128] sm:$0xff] }
  0x53   :  { %753 = vmatmul.f32.vlgmr.msrb.gmra.mxu2 %v1279_v41  ;;  %817 = vmatpush.msrb.mxu3 %v575_v8  ;;  %v146_v41 = vmul.f32 %v1405_v22, %v1405_v22  ;;  %v164_v6 = vmul.f32 %v1434_v55, %v1434_v55  ;;  %v167_v8 = vmul.f32 %v1261_v17, %v1261_v17 }
  0x54   :  { %878 = vmatpush.msrb.mxu0 %v595_v11  ;;  %818 = vmatmul.f32.vlgmr.msrb.gmra.mxu3 %v1285_v52  ;;  %v239_v52 = vadd.f32 %v238_v27, %v155_v33  ;;  %v246_v50 = vadd.f32 %v245_v13, %v161_v45  ;;  %v168_v11 = vmul.f32 %v1432_v51, %v1432_v51  ;;  %v1454_v33 = vld [vmem:[#allocation2 + $0x170] sm:$0xff]  ;;  %v1494_v13 = vld [vmem:[#allocation2 + $0x188] sm:$0xff] }
  0x55   :  { %632 = vmatmul.f32.gmra.mxu0 %v1350_v63  ;;  %223 = vadd.xlane.f32.xlu1 %v222_v9  ;;  %v249_v63 = vadd.f32 %v163_v30, %v162_v29  ;;  %v228_v54 = vadd.f32 %v227_v40, %v146_v41  ;;  %v1442_v9 = vld [vmem:[#allocation2 + $0x130] sm:$0xff]  ;;  %v166_v17 = vmul.f32 %v1450_v18, %v1450_v18  ;;  %v1476_v41 = vld [vmem:[#allocation2 + $0x198] sm:$0xff] }
  0x56   :  { %879 = vmatpush.msrb.mxu0 %v594_v31  ;;  %235 = vadd.xlane.f32.xlu2 %v234_v19  ;;  %v240_v0 = vadd.f32 %v239_v52, %v156_v57  ;;  %v255_v19 = vadd.f32 %v168_v11, %v167_v8  ;;  %v172_v29 = vmul.f32 %v1270_v32, %v1270_v32  ;;  %v1478_v40 = vld [vmem:[#allocation2 + $0x178] sm:$0xff]  ;;  %v1516_v8 = vld [vmem:[#allocation2 + $0x1b0] sm:$0xff]  ;;  %v1518_v11 = vld [vmem:[#allocation2 + $0x1e8] sm:$0xff] }
  0x57   :  { %v250_v12 = vadd.f32 %v249_v63, %v164_v6  ;;  %v173_v31 = vmul.f32 %v1454_v33, %v1454_v33  ;;  %v177_v57 = vmul.f32 %v1287_v56, %v1287_v56  ;;  %v178_v52 = vmul.f32 %v1476_v41, %v1476_v41  ;;  %v1498_v56 = vld [vmem:[#allocation2 + $0x1c0] sm:$0xff] }
  0x58   :  { %880 = vmatpush.msrb.mxu0 %v593_v42 }
  0x59   :  { %v261_v42 = vadd.f32 %v173_v31, %v172_v29  ;;  %v267_v63 = vadd.f32 %v178_v52, %v177_v57  ;;  %v1537_v29 = vld [vmem:[#allocation2 + $0x210] sm:$0xff]  ;;  %v1542_v31 = vld [vmem:[#allocation2 + $0x238] sm:$0xff] }
  0x5a   :  { %881 = vmatpush.msrb.mxu0 %v592_v48  ;;  %691 = vmatmul.f32.gmra.mxu1 %v1291_v59  ;;  %v165_v59 = vmul.f32 %v1442_v9, %v1442_v9  ;;  %v198_v57 = vmul.f32 %v1542_v31, %v1542_v31 }
  0x5b   :  { %756 = vmatmul.f32.gmra.mxu2 %v1311_v14  ;;  %247 = vadd.xlane.f32.xlu0 %v246_v50 }
  0x5c   :  { %882 = vmatpush.msrb.mxu0 %v591_v53  ;;  %821 = vmatmul.f32.gmra.mxu3 %v1328_v37  ;;  %v251_v14 = vadd.f32 %v250_v12, %v165_v59  ;;  %v169_v37 = vmul.f32 %v1456_v28, %v1456_v28  ;;  %v1500_v53 = vld [vmem:[#allocation2 + $0x1a0] sm:$0xff] }
  0x5d   :  { %883 = vmatmul.f32.vlgmr.msrb.gmra.mxu0 %v1297_v1  ;;  %229 = vadd.xlane.f32.xlu1 %v228_v54  ;;  %v1462_v1 = vld [vmem:[#allocation2 + $0x158] sm:$0xff]  ;;  %v182_v54 = vmul.f32 %v1338_v47, %v1338_v47 }
  0x5e   :  { %241 = vadd.xlane.f32.xlu2 %v240_v0  ;;  %v252_v27 = vadd.f32 %v251_v14, %v166_v17  ;;  %v170_v30 = vmul.f32 %v1462_v1, %v1462_v1  ;;  %v256_v36 = vadd.f32 %v255_v19, %v169_v37  ;;  %v183_v0 = vmul.f32 %v1498_v56, %v1498_v56  ;;  %v1526_v14 = vld [vmem:[#allocation2 + $0x1c8] sm:$0xff]  ;;  %v1532_v19 = vld [vmem:[#allocation2 + $0x1d0] sm:$0xff] }
  0x5f   :  { %v187_v17 = vmul.f32 %v1263_v20, %v1263_v20  ;;  %v185_v20 = vmul.f32 %v1532_v19, %v1532_v19 }
  0x60   :  { %v257_v38 = vadd.f32 %v256_v36, %v170_v30  ;;  %v273_v47 = vadd.f32 %v183_v0, %v182_v54  ;;  %v1546_v36 = vld [vmem:[#allocation2 + $0x1f0] sm:$0xff]  ;;  %v1576_v54 = vld [vmem:[#allocation2 + $0x240] sm:$0xff]  ;;  %v1578_v0 = vld [vmem:[#allocation2 + $0x268] sm:$0xff] }
  0x62   :  { %694 = vmatmul.f32.gmra.mxu1 %v1300_v4  ;;  %v1472_v4 = vld [vmem:[#allocation2 + $0x160] sm:$0xff] }
  0x63   :  { %759 = vmatmul.f32.gmra.mxu2 %v1322_v26  ;;  %v171_v26 = vmul.f32 %v1472_v4, %v1472_v4 }
  0x64   :  { %824 = vmatmul.f32.gmra.mxu3 %v1332_v43  ;;  %v174_v43 = vmul.f32 %v1478_v40, %v1478_v40 }
  0x65   :  { %886 = vmatmul.f32.gmra.mxu0 %v1348_v61  ;;  %253 = vadd.xlane.f32.xlu1 %v252_v27  ;;  %v258_v32 = vadd.f32 %v257_v38, %v171_v26  ;;  %v1484_v61 = vld [vmem:[#allocation2 + $0x180] sm:$0xff]  ;;  %v189_v26 = vmul.f32 %v1546_v36, %v1546_v36  ;;  %v192_v38 = vmul.f32 %v1277_v39, %v1277_v39 }
  0x66   :  { %v175_v45 = vmul.f32 %v1484_v61, %v1484_v61 }
  0x67   :  { %259 = vadd.xlane.f32.xlu2 %v258_v32  ;;  %v1556_v32 = vld [vmem:[#allocation2 + $0x1f8] sm:$0xff] }
  0x68   :  { %v190_v52 = vmul.f32 %v1556_v32, %v1556_v32 }
  0x6a   :  { %697 = vmatmul.f32.gmra.mxu1 %v1340_v49  ;;  %v262_v49 = vadd.f32 %v261_v42, %v174_v43  ;;  %v197_v43 = vmul.f32 %v1305_v7, %v1305_v7 }
  0x6b   :  { %762 = vmatmul.f32.gmra.mxu2 %v1374_v24  ;;  %v176_v24 = vmul.f32 %v1494_v13, %v1494_v13 }
  0x6c   :  { %827 = vmatmul.f32.gmra.mxu3 %v1392_v60  ;;  %v263_v48 = vadd.f32 %v262_v49, %v175_v45  ;;  %v179_v60 = vmul.f32 %v1500_v53, %v1500_v53  ;;  %v202_v49 = vmul.f32 %v1358_v3, %v1358_v3 }
  0x6d   :  { %889 = vmatmul.f32.gmra.mxu0 %v1366_v15  ;;  %v1506_v15 = vld [vmem:[#allocation2 + $0x1a8] sm:$0xff] }
  0x6e   :  { %v264_v50 = vadd.f32 %v263_v48, %v176_v24  ;;  %v180_v6 = vmul.f32 %v1506_v15, %v1506_v15  ;;  %v1569_v24 = vld [vmem:[#allocation2 + $0x200] sm:$0xff] }
  0x6f   :  { %v191_v7 = vmul.f32 %v1569_v24, %v1569_v24 }
  0x70   :  { %265 = vadd.xlane.f32.xlu0 %v264_v50  ;;  %v291_v50 = vadd.f32 %v198_v57, %v197_v43 }
  0x72   :  { %700 = vmatmul.f32.gmra.mxu1 %v1295_v62  ;;  %v268_v62 = vadd.f32 %v267_v63, %v179_v60 }
  0x73   :  { %765 = vmatmul.f32.gmra.mxu2 %v1326_v34  ;;  %v181_v34 = vmul.f32 %v1516_v8, %v1516_v8 }
  0x74   :  { %830 = vmatmul.f32.gmra.mxu3 %v1346_v58  ;;  %v269_v59 = vadd.f32 %v268_v62, %v180_v6  ;;  %v188_v58 = vmul.f32 %v1518_v11, %v1518_v11  ;;  %v204_v62 = vmul.f32 %v1578_v0, %v1578_v0 }
  0x75   :  { %892 = vmatmul.f32.gmra.mxu0 %v1405_v22  ;;  %v184_v22 = vmul.f32 %v1526_v14, %v1526_v14 }
  0x76   :  { %v270_v12 = vadd.f32 %v269_v59, %v181_v34  ;;  %v279_v37 = vadd.f32 %v188_v58, %v187_v17  ;;  %v115_v34 = vld [vmem:[#allocation2 + $0x220] sm:$0xff]  ;;  %v1586_v59 = vld [vmem:[#allocation2 + $0x270] sm:$0xff] }
  0x77   :  { %v274_v27 = vadd.f32 %v273_v47, %v184_v22  ;;  %v1591_v58 = vld [vmem:[#allocation2 + $0x250] sm:$0xff]  ;;  %v116_v22 = vld [vmem:[#allocation2 + $0x228] sm:$0xff] }
  0x78   :  { %271 = vadd.xlane.f32.xlu1 %v270_v12  ;;  %v280_v45 = vadd.f32 %v279_v37, %v189_v26  ;;  %v195_v12 = vmul.f32 %v115_v34, %v115_v34  ;;  %v196_v26 = vmul.f32 %v116_v22, %v116_v22 }
  0x79   :  { %v275_v30 = vadd.f32 %v274_v27, %v185_v20  ;;  %v1593_v20 = vld [vmem:[#allocation2 + $0x278] sm:$0xff]  ;;  %v205_v27 = vmul.f32 %v1586_v59, %v1586_v59 }
  0x7a   :  { %703 = vmatmul.f32.gmra.mxu1 %v1336_v46  ;;  %v1540_v46 = vld [vmem:[#allocation2 + $0x1d8] sm:$0xff]  ;;  %v281_v48 = vadd.f32 %v280_v45, %v190_v52 }
  0x7b   :  { %768 = vmatmul.f32.gmra.mxu2 %v1384_v16  ;;  %v186_v16 = vmul.f32 %v1540_v46, %v1540_v46 }
  0x7c   :  { %833 = vmatmul.f32.gmra.mxu3 %v1396_v5  ;;  %v1548_v5 = vld [vmem:[#allocation2 + $0x260] sm:$0xff]  ;;  %v282_v3 = vadd.f32 %v281_v48, %v191_v7 }
  0x7d   :  { %895 = vmatmul.f32.gmra.mxu0 %v1376_v25  ;;  %v193_v25 = vmul.f32 %v1537_v29, %v1537_v29  ;;  %v276_v42 = vadd.f32 %v275_v30, %v186_v16  ;;  %v203_v39 = vmul.f32 %v1548_v5, %v1548_v5  ;;  %v201_v16 = vmul.f32 %v1591_v58, %v1591_v58 }
  0x7e   :  { %283 = vadd.xlane.f32.xlu0 %v282_v3 }
  0x7f   :  { %277 = vadd.xlane.f32.xlu2 %v276_v42  ;;  %v285_v63 = vadd.f32 %v193_v25, %v192_v38  ;;  %v297_v60 = vadd.f32 %v203_v39, %v202_v49 }
  0x81   :  { %v298_v37 = vadd.f32 %v297_v60, %v204_v62 }
  0x82   :  { %706 = vmatmul.f32.gmra.mxu1 %v1354_v2  ;;  %v114_v2 = vld [vmem:[#allocation2 + $0x218] sm:$0xff] }
  0x83   :  { %771 = vmatmul.f32.gmra.mxu2 %v1402_v21  ;;  %v199_v21 = vmul.f32 %v1576_v54, %v1576_v54  ;;  %v194_v6 = vmul.f32 %v114_v2, %v114_v2  ;;  %v299_v25 = vadd.f32 %v298_v37, %v205_v27 }
  0x84   :  { %836 = vmatmul.f32.gmra.mxu3 %v1416_v35  ;;  %v1584_v35 = vld [vmem:[#allocation2 + $0x248] sm:$0xff] }
  0x85   :  { %898 = vmatmul.f32.gmra.mxu0 %v1407_v23  ;;  %v200_v23 = vmul.f32 %v1584_v35, %v1584_v35  ;;  %v292_v47 = vadd.f32 %v291_v50, %v199_v21  ;;  %v286_v17 = vadd.f32 %v285_v63, %v194_v6  ;;  %v932_v50 = vlaneseq }
  0x87   :  { %v293_v30 = vadd.f32 %v292_v47, %v200_v23  ;;  %v287_v38 = vadd.f32 %v286_v17, %v195_v12 }
  0x89   :  { %v294_v42 = vadd.f32 %v293_v30, %v201_v16  ;;  %v288_v43 = vadd.f32 %v287_v38, %v196_v26 }
  0x8a   :  { %709 = vmatmul.f32.gmra.mxu1 %v1398_v10  ;;  %v206_v10 = vmul.f32 %v1593_v20, %v1593_v20 }
  0x8b   :  { %774 = vmatmul.f32.gmra.mxu2 %v1434_v55  ;;  %295 = vadd.xlane.f32.xlu2 %v294_v42 }
  0x8c   :  { %839 = vmatmul.f32.gmra.mxu3 %v1442_v9  ;;  %v300_v57 = vadd.f32 %v299_v25, %v206_v10  ;;  %289 = vadd.xlane.f32.xlu1 %v288_v43 }
  0x8d   :  { %901 = vmatmul.f32.gmra.mxu0 %v1428_v44 }
  0x8e   :  { %301 = vadd.xlane.f32.xlu0 %v300_v57 }
  0x92   :  { %712 = vmatmul.f32.gmra.mxu1 %v1432_v51 }
  0x93   :  { %777 = vmatmul.f32.gmra.mxu2 %v1456_v28 }
  0x94   :  { %842 = vmatmul.f32.gmra.mxu3 %v1462_v1 }
  0x95   :  { %904 = vmatmul.f32.gmra.mxu0 %v1450_v18 }
  0x9a   :  { %715 = vmatmul.f32.gmra.mxu1 %v1454_v33 }
  0x9b   :  { %780 = vmatmul.f32.gmra.mxu2 %v1478_v40 }
  0x9c   :  { %845 = vmatmul.f32.gmra.mxu3 %v1484_v61 }
  0x9d   :  { %907 = vmatmul.f32.gmra.mxu0 %v1472_v4 }
  0xa2   :  { %718 = vmatmul.f32.gmra.mxu1 %v1476_v41 }
  0xa3   :  { %783 = vmatmul.f32.gmra.mxu2 %v1500_v53 }
  0xa4   :  { %848 = vmatmul.f32.gmra.mxu3 %v1506_v15 }
  0xa5   :  { %910 = vmatmul.f32.gmra.mxu0 %v1494_v13 }
  0xa9   :  { %v1616_v44 = vpop.f32.mrf.mxu1 }
  0xaa   :  { %721 = vmatmul.f32.gmra.mxu1 %v1498_v56 }
  0xab   :  { %786 = vmatmul.f32.gmra.mxu2 %v1526_v14 }
  0xac   :  { %851 = vmatmul.f32.gmra.mxu3 %v1532_v19 }
  0xad   :  { %913 = vmatmul.f32.gmra.mxu0 %v1516_v8 }
  0xaf   :  { %v1622_v51 = vpop.f32.mrf.mxu2  ;;  %v1631_v18 = vpop.f32.mrf.mxu0 }
  0xb1   :  { %v1624_v55 = vpop.f32.mrf.mxu3 }
  0xb2   :  { %724 = vmatmul.f32.gmra.mxu1 %v1518_v11  ;;  %v1627_v9 = vpop.f32.mrf.mxu1 }
  0xb3   :  { %789 = vmatmul.f32.gmra.mxu2 %v1546_v36 }
  0xb4   :  { %854 = vmatmul.f32.gmra.mxu3 %v1556_v32 }
  0xb5   :  { %916 = vmatmul.f32.gmra.mxu0 %v1540_v46 }
  0xb7   :  { %v1634_v33 = vpop.f32.mrf.mxu2 }
  0xba   :  { %727 = vmatmul.f32.gmra.mxu1 %v1537_v29  ;;  %v212_v28 = vpop.xlane.xlu0 %211  ;;  %v1637_v1 = vpop.f32.mrf.mxu3 }
  0xbb   :  { %792 = vmatmul.f32.gmra.mxu2 %v114_v2  ;;  %1081 = vrsqrt.f32 %v212_v28  ;;  %v1639_v4 = vpop.f32.mrf.mxu1  ;;  %vm310_vm0 = vcmp.eq.f32.partialorder %v212_v28, inf  ;;  %v313_v36 = vand.u32 2147483648, %v212_v28  ;;  %vm312_vm1 = vcmp.eq.f32.partialorder %v212_v28, 0.0 }
  0xbc   :  { %857 = vmatmul.f32.gmra.mxu3 %v115_v34 }
  0xbd   :  { %919 = vmatmul.f32.gmra.mxu0 %v1569_v24  ;;  %v1642_v41 = vpop.f32.mrf.mxu0 }
  0xc0   :  { %v1645_v13 = vpop.f32.mrf.mxu2 }
  0xc1   :  { %v1082_v40 = vpop.eup %1081 }
  0xc2   :  { %v304_v61 = vmul.f32 %v1082_v40, %v212_v28  ;;  %730 = vmatmul.f32.gmra.mxu1 %v1542_v31 }
  0xc3   :  { %795 = vmatmul.f32.gmra.mxu2 %v1576_v54 }
  0xc4   :  { %v305_v56 = vmul.f32 %v1082_v40, %v304_v61  ;;  %860 = vmatmul.f32.gmra.mxu3 %v1584_v35  ;;  %v1649_v53 = vpop.f32.mrf.mxu3 }
  0xc5   :  { %922 = vmatmul.f32.gmra.mxu0 %v116_v22  ;;  %v1651_v15 = vpop.xlane.xlu0 %217  ;;  %v1653_v8 = vpop.f32.mrf.mxu1 }
  0xc6   :  { %v306_v11 = vmul.f32 0.5, %v305_v56  ;;  %1083 = vrsqrt.f32 %v1651_v15  ;;  %vm322_vm2 = vcmp.eq.f32.partialorder %v1651_v15, inf  ;;  %v325_v22 = vand.u32 2147483648, %v1651_v15 }
  0xc7   :  { %vm324_vm4 = vcmp.eq.f32.partialorder %v1651_v15, 0.0 }
  0xc8   :  { %v307_v14 = vsub.f32 1.5, %v306_v11  ;;  %v1656_v19 = vpop.f32.mrf.mxu0  ;;  %v1658_v29 = vpop.xlane.xlu1 %223 }
  0xc9   :  { %1085 = vrsqrt.f32 %v1658_v29  ;;  %v1661_v46 = vpop.xlane.xlu2 %235  ;;  %vm334_vm5 = vcmp.eq.f32.partialorder %v1658_v29, inf  ;;  %vm336_vm6 = vcmp.eq.f32.partialorder %v1658_v29, 0.0 }
  0xca   :  { %v308_v31 = vmul.f32 %v1082_v40, %v307_v14  ;;  %733 = vmatmul.f32.gmra.mxu1 %v1548_v5  ;;  %1087 = vrsqrt.f32 %v1661_v46  ;;  %vm358_vm9 = vcmp.eq.f32.partialorder %v1661_v46, inf  ;;  %vm360_vm10 = vcmp.eq.f32.partialorder %v1661_v46, 0.0 }
  0xcb   :  { %798 = vmatmul.f32.gmra.mxu2 %v1578_v0  ;;  %v1667_v45 = vpop.f32.mrf.mxu2 }
  0xcc   :  { %v1084_v32 = vpop.eup %1083  ;;  %v309_v52 = vmul.f32 %v308_v31, %v212_v28  ;;  %863 = vmatmul.f32.gmra.mxu3 %v1586_v59  ;;  %v1685_v59 = vand.u32 127, %v932_v50 }
  0xcd   :  { %v316_v49 = vmul.f32 %v1084_v32, %v1651_v15  ;;  %925 = vmatmul.f32.gmra.mxu0 %v1591_v58 }
  0xce   :  { %v1671_v39 = vpop.f32.mrf.mxu3  ;;  %v311_v5 = vsel %vm310_vm0, %v212_v28, %v309_v52  ;;  %v1688_v23 = vpop.xlane.xlu0 %247  ;;  %vm934_vm3 = vcmp.lt.s32.totalorder %v1685_v59, 64 }
  0xcf   :  { %v1086_v24 = vpop.eup %1085  ;;  %v317_v7 = vmul.f32 %v1084_v32, %v316_v49  ;;  %v689_v48 = vpop.f32.mrf.mxu1  ;;  %v314_v63 = vsel %vm312_vm1, %v313_v36, %v311_v5  ;;  %v1716_v49 = vld [vmem:[%s1952_s2] ss:$0 sm:$0xff]  ;;  %vm382_vm13 = vcmp.eq.f32.partialorder %v1688_v23, inf  ;;  %vm384_vm14 = vcmp.eq.f32.partialorder %v1688_v23, 0.0  ;;  %s1229_s2 = smov [#allocation7]  }
  0xd0   :  { %v1673_v3 = vpop.eup %1087  ;;  %v328_v60 = vmul.f32 %v1086_v24, %v1658_v29  ;;  %v1676_v54 = vpop.xlane.xlu1 %229  ;;  %v495_v2 = vadd.f32 1e-05, %v314_v63  ;;  %v690_v58 = vadd.f32 %v689_v48, %v1631_v18  ;;  %s1009_s26 = sshll.u32 %s1229_s2, 4  ;;  %s1010_s26 = int_to_ptr.vmem [resolvable:$true] %s1009_s26 }
  0xd1   :  { %v318_v0 = vmul.f32 0.5, %v317_v7  ;;  %1089 = vrsqrt.f32 %v1676_v54  ;;  %v1679_v21 = vpop.xlane.xlu2 %241  ;;  %v352_v35 = vmul.f32 %v1673_v3, %v1661_v46  ;;  %vm346_vm7 = vcmp.eq.f32.partialorder %v1676_v54, inf }
  0xd2   :  { %v329_v6 = vmul.f32 %v1086_v24, %v328_v60  ;;  %v1681_v62 = vpop.f32.mrf.mxu0  ;;  %1091 = vrcp.f32 %v495_v2  ;;  %vm348_vm8 = vcmp.eq.f32.partialorder %v1676_v54, 0.0  ;;  %vm370_vm11 = vcmp.eq.f32.partialorder %v1679_v21, inf }
  0xd3   :  { %v319_v34 = vsub.f32 1.5, %v318_v0  ;;  %1093 = vrsqrt.f32 %v1679_v21  ;;  %v353_v12 = vmul.f32 %v1673_v3, %v352_v35  ;;  %vm372_vm12 = vcmp.eq.f32.partialorder %v1679_v21, 0.0 }
  0xd4   :  { %v330_v47 = vmul.f32 0.5, %v329_v6  ;;  %1095 = vrsqrt.f32 %v1688_v23 }
  0xd5   :  { %v320_v17 = vmul.f32 %v1084_v32, %v319_v34  ;;  %928 = vmatmul.f32.gmra.mxu0 %v1593_v20  ;;  %v354_v16 = vmul.f32 0.5, %v353_v12  ;;  %v337_v20 = vand.u32 2147483648, %v1658_v29 }
  0xd6   :  { %v331_v27 = vsub.f32 1.5, %v330_v47  ;;  %v754_v37 = vpop.f32.mrf.mxu2 }
  0xd7   :  { %v1090_v30 = vpop.eup %1089  ;;  %v321_v26 = vmul.f32 %v320_v17, %v1651_v15  ;;  %v755_v38 = vadd.f32 %v754_v37, %v690_v58  ;;  %v692_v10 = vpop.f32.mrf.mxu1  ;;  %v355_v40 = vsub.f32 1.5, %v354_v16 }
  0xd8   :  { %v819_v25 = vpop.f32.mrf.mxu3  ;;  %v1092_v42 = vpop.eup %1091  ;;  %v332_v43 = vmul.f32 %v1086_v24, %v331_v27  ;;  %v340_v57 = vmul.f32 %v1090_v30, %v1676_v54  ;;  %v693_v63 = vadd.f32 %v692_v10, %v1642_v41 }
  0xd9   :  { %v1094_v18 = vpop.eup %1093  ;;  %v820_v28 = vadd.f32 %v819_v25, %v755_v38  ;;  %v323_v61 = vsel %vm322_vm2, %v1651_v15, %v321_v26  ;;  %v1706_v56 = vpop.xlane.xlu1 %253  ;;  %v937_v36 = vsel %vm934_vm3, %v1092_v42, 1.0  ;;  %v356_v6 = vmul.f32 %v1673_v3, %v355_v40 }
  0xda   :  { %v333_v11 = vmul.f32 %v332_v43, %v1658_v29  ;;  %v341_v14 = vmul.f32 %v1090_v30, %v340_v57  ;;  %v884_v31 = vpop.f32.mrf.mxu0  ;;  %v326_v32 = vsel %vm324_vm4, %v325_v22, %v323_v61  ;;  %v364_v24 = vmul.f32 %v1094_v18, %v1679_v21  ;;  %v1719_v7 = vpop.eup %1095 }
  0xdb   :  { %v885_v52 = vadd.f32 %v884_v31, %v820_v28  ;;  %v496_v5 = vadd.f32 1e-05, %v326_v32  ;;  %1097 = vrsqrt.f32 %v1706_v56  ;;  %v376_v22 = vmul.f32 %v1719_v7, %v1688_v23  ;;  %v1734_v3 = vpop.xlane.xlu2 %259 }
  0xdc   :  { %v342_v48 = vmul.f32 0.5, %v341_v14  ;;  %v335_v50 = vsel %vm334_vm5, %v1658_v29, %v333_v11  ;;  %v365_v60 = vmul.f32 %v1094_v18, %v364_v24  ;;  %v349_v29 = vand.u32 2147483648, %v1676_v54 }
  0xdd   :  { %v953_v15 = vmul.f32 %v937_v36, %v885_v52  ;;  %1099 = vrcp.f32 %v496_v5  ;;  %v338_v2 = vsel %vm336_vm6, %v337_v20, %v335_v50  ;;  %v357_v38 = vmul.f32 %v356_v6, %v1661_v46 }
  0xde   :  { %v343_v0 = vsub.f32 1.5, %v342_v48  ;;  %v757_v35 = vpop.f32.mrf.mxu2  ;;  %v497_v34 = vadd.f32 1e-05, %v338_v2  ;;  %v366_v58 = vmul.f32 0.5, %v365_v60  ;;  %v377_v43 = vmul.f32 %v1719_v7, %v376_v22 }
  0xdf   :  { %v973_v47 = vadd.f32 %v1716_v49, %v953_v15  ;;  %v758_v41 = vadd.f32 %v757_v35, %v693_v63  ;;  %v695_v12 = vpop.f32.mrf.mxu1  ;;  %v361_v20 = vand.u32 2147483648, %v1661_v46  ;;  %v359_v52 = vsel %vm358_vm9, %v1661_v46, %v357_v38 }
  0xe0   :  { %v822_v17 = vpop.f32.mrf.mxu3  ;;  %v344_v27 = vmul.f32 %v1090_v30, %v343_v0  ;;  %1101 = vrcp.f32 %v497_v34  ;;  %v367_v25 = vsub.f32 1.5, %v366_v58  ;;  %v696_v40 = vadd.f32 %v695_v12, %v1656_v19 }
  0xe1   :  { %989 = vst [vmem:[#allocation7] sm:$0xff] %v973_v47  ;;  %v823_v37 = vadd.f32 %v822_v17, %v758_v41  ;;  %v1736_v16 = vpop.eup %1097  ;;  %1103 = vrsqrt.f32 %v1734_v3  ;;  %v378_v50 = vmul.f32 0.5, %v377_v43  ;;  %v362_v15 = vsel %vm360_vm10, %v361_v20, %v359_v52 }
  0xe2   :  { %v345_v26 = vmul.f32 %v344_v27, %v1676_v54  ;;  %v887_v10 = vpop.f32.mrf.mxu0  ;;  %v368_v14 = vmul.f32 %v1094_v18, %v367_v25  ;;  %v388_v32 = vmul.f32 %v1736_v16, %v1706_v56  ;;  %v373_v47 = vand.u32 2147483648, %v1679_v21 }
  0xe3   :  { %v1100_v30 = vpop.eup %1099  ;;  %v888_v42 = vadd.f32 %v887_v10, %v823_v37  ;;  %v1762_v6 = vpop.xlane.xlu0 %265  ;;  %v379_v34 = vsub.f32 1.5, %v378_v50  ;;  %v499_v41 = vadd.f32 1e-05, %v362_v15  ;;  %vm394_vm15 = vcmp.eq.f32.partialorder %v1706_v56, inf }
  0xe4   :  { %v938_v57 = vsel %vm934_vm3, %v1100_v30, 1.0  ;;  %v347_v28 = vsel %vm346_vm7, %v1676_v54, %v345_v26  ;;  %v369_v18 = vmul.f32 %v368_v14, %v1679_v21  ;;  %v389_v46 = vmul.f32 %v1736_v16, %v388_v32 }
  0xe5   :  { %v954_v61 = vmul.f32 %v938_v57, %v888_v42  ;;  %v350_v11 = vsel %vm348_vm8, %v349_v29, %v347_v28  ;;  %v380_v38 = vmul.f32 %v1719_v7, %v379_v34  ;;  %v385_v32 = vand.u32 2147483648, %v1688_v23 }
  0xe6   :  { %v760_v31 = vpop.f32.mrf.mxu2  ;;  %v498_v36 = vadd.f32 1e-05, %v350_v11  ;;  %v1102_v5 = vpop.eup %1101  ;;  %v390_v27 = vmul.f32 0.5, %v389_v46  ;;  %v371_v29 = vsel %vm370_vm11, %v1679_v21, %v369_v18  ;;  %vm396_vm0 = vcmp.eq.f32.partialorder %v1706_v56, 0.0 }
  0xe7   :  { %v974_v24 = vadd.f32 %v1716_v49, %v954_v61  ;;  %v761_v54 = vadd.f32 %v760_v31, %v696_v40  ;;  %v698_v48 = vpop.f32.mrf.mxu1  ;;  %v1756_v60 = vpop.eup %1103  ;;  %v939_v0 = vsel %vm934_vm3, %v1102_v5, 1.0  ;;  %v374_v43 = vsel %vm372_vm12, %v373_v47, %v371_v29 }
  0xe8   :  { %v825_v63 = vpop.f32.mrf.mxu3  ;;  %1105 = vrcp.f32 %v498_v36  ;;  %v699_v12 = vadd.f32 %v698_v48, %v1681_v62  ;;  %v400_v58 = vmul.f32 %v1756_v60, %v1734_v3  ;;  %v391_v28 = vsub.f32 1.5, %v390_v27 }
  0xe9   :  { %990 = vst [vmem:[#allocation7 + $0x8] sm:$0xff] %v974_v24  ;;  %v826_v19 = vadd.f32 %v825_v63, %v761_v54  ;;  %1107 = vrsqrt.f32 %v1762_v6  ;;  %v381_v7 = vmul.f32 %v380_v38, %v1688_v23  ;;  %v500_v11 = vadd.f32 1e-05, %v374_v43 }
  0xea   :  { %v890_v2 = vpop.f32.mrf.mxu0  ;;  %1109 = vrcp.f32 %v499_v41  ;;  %v401_v42 = vmul.f32 %v1756_v60, %v400_v58  ;;  %v392_v52 = vmul.f32 %v1736_v16, %v391_v28  ;;  %vm406_vm1 = vcmp.eq.f32.partialorder %v1734_v3, inf }
  0xeb   :  { %v891_v35 = vadd.f32 %v890_v2, %v826_v19  ;;  %v1777_v21 = vpop.xlane.xlu1 %271  ;;  %vm408_vm2 = vcmp.eq.f32.partialorder %v1734_v3, 0.0  ;;  %vm418_vm4 = vcmp.eq.f32.partialorder %v1762_v6, inf  ;;  %vm420_vm5 = vcmp.eq.f32.partialorder %v1762_v6, 0.0 }
  0xec   :  { %v402_v36 = vmul.f32 0.5, %v401_v42  ;;  %1111 = vrsqrt.f32 %v1777_v21  ;;  %v393_v16 = vmul.f32 %v392_v52, %v1706_v56  ;;  %vm430_vm6 = vcmp.eq.f32.partialorder %v1777_v21, inf }
  0xed   :  { %v955_v17 = vmul.f32 %v939_v0, %v891_v35  ;;  %1113 = vrcp.f32 %v500_v11  ;;  %vm432_vm7 = vcmp.eq.f32.partialorder %v1777_v21, 0.0 }
  0xee   :  { %v763_v22 = vpop.f32.mrf.mxu2  ;;  %v1106_v37 = vpop.eup %1105  ;;  %v403_v18 = vsub.f32 1.5, %v402_v36 }
  0xef   :  { %v975_v26 = vadd.f32 %v1716_v49, %v955_v17  ;;  %v764_v10 = vadd.f32 %v763_v22, %v699_v12  ;;  %v701_v25 = vpop.f32.mrf.mxu1  ;;  %v940_v57 = vsel %vm934_vm3, %v1106_v37, 1.0  ;;  %v1779_v40 = vpop.eup %1107 }
  0xf0   :  { %v828_v62 = vpop.f32.mrf.mxu3  ;;  %v702_v14 = vadd.f32 %v701_v25, %v1616_v44  ;;  %v412_v24 = vmul.f32 %v1779_v40, %v1762_v6  ;;  %v1110_v54 = vpop.eup %1109  ;;  %v383_v44 = vsel %vm382_vm13, %v1688_v23, %v381_v7  ;;  %v397_v23 = vand.u32 2147483648, %v1706_v56 }
  0xf1   :  { %991 = vst [vmem:[#allocation7 + $0x10] sm:$0xff] %v975_v26  ;;  %v829_v30 = vadd.f32 %v828_v62, %v764_v10  ;;  %v941_v0 = vsel %vm934_vm3, %v1110_v54, 1.0  ;;  %v386_v35 = vsel %vm384_vm14, %v385_v32, %v383_v44  ;;  %v404_v58 = vmul.f32 %v1756_v60, %v403_v18  ;;  %v1819_v11 = vpop.xlane.xlu0 %283 }
  0xf2   :  { %v893_v20 = vpop.f32.mrf.mxu0  ;;  %v413_v46 = vmul.f32 %v1779_v40, %v412_v24  ;;  %v1796_v34 = vpop.eup %1111  ;;  %v501_v22 = vadd.f32 1e-05, %v386_v35  ;;  %v395_v26 = vsel %vm394_vm15, %v1706_v56, %v393_v16  ;;  %vm454_vm10 = vcmp.eq.f32.partialorder %v1819_v11, inf }
  0xf3   :  { %v894_v61 = vadd.f32 %v893_v20, %v829_v30  ;;  %v1799_v41 = vpop.xlane.xlu2 %277  ;;  %v424_v37 = vmul.f32 %v1796_v34, %v1777_v21  ;;  %v1114_v38 = vpop.eup %1113  ;;  %v398_v60 = vsel %vm396_vm0, %v397_v23, %v395_v26  ;;  %v405_v42 = vmul.f32 %v404_v58, %v1734_v3 }
  0xf4   :  { %v414_v29 = vmul.f32 0.5, %v413_v46  ;;  %1115 = vrsqrt.f32 %v1799_v41  ;;  %v942_v20 = vsel %vm934_vm3, %v1114_v38, 1.0  ;;  %v502_v36 = vadd.f32 1e-05, %v398_v60 }
  0xf5   :  { %v956_v31 = vmul.f32 %v940_v57, %v894_v61  ;;  %1117 = vrcp.f32 %v501_v22  ;;  %v425_v28 = vmul.f32 %v1796_v34, %v424_v37  ;;  %v407_v24 = vsel %vm406_vm1, %v1734_v3, %v405_v42 }
  0xf6   :  { %v766_v5 = vpop.f32.mrf.mxu2  ;;  %v415_v57 = vsub.f32 1.5, %v414_v29  ;;  %1119 = vrsqrt.f32 %v1819_v11  ;;  %vm442_vm8 = vcmp.eq.f32.partialorder %v1799_v41, inf  ;;  %vm444_vm9 = vcmp.eq.f32.partialorder %v1799_v41, 0.0 }
  0xf7   :  { %v976_v48 = vadd.f32 %v1716_v49, %v956_v31  ;;  %v767_v63 = vadd.f32 %v766_v5, %v702_v14  ;;  %v704_v50 = vpop.f32.mrf.mxu1  ;;  %v409_v14 = vand.u32 2147483648, %v1734_v3  ;;  %v426_v5 = vmul.f32 0.5, %v425_v28 }
  0xf8   :  { %v831_v19 = vpop.f32.mrf.mxu3  ;;  %v705_v12 = vadd.f32 %v704_v50, %v1627_v9  ;;  %v416_v32 = vmul.f32 %v1779_v40, %v415_v57  ;;  %1121 = vrcp.f32 %v502_v36  ;;  %vm456_vm11 = vcmp.eq.f32.partialorder %v1819_v11, 0.0 }
  0xf9   :  { %992 = vst [vmem:[#allocation7 + $0x18] sm:$0xff] %v976_v48  ;;  %v832_v15 = vadd.f32 %v831_v19, %v767_v63  ;;  %v427_v18 = vsub.f32 1.5, %v426_v5  ;;  %v410_v3 = vsel %vm408_vm2, %v409_v14, %v407_v24 }
  0xfa   :  { %v896_v2 = vpop.f32.mrf.mxu0  ;;  %v1817_v61 = vpop.eup %1115  ;;  %v417_v16 = vmul.f32 %v416_v32, %v1762_v6  ;;  %v503_v23 = vadd.f32 1e-05, %v410_v3 }
  0xfb   :  { %v897_v47 = vadd.f32 %v896_v2, %v832_v15  ;;  %v1118_v54 = vpop.eup %1117  ;;  %v436_v44 = vmul.f32 %v1817_v61, %v1799_v41  ;;  %v428_v58 = vmul.f32 %v1796_v34, %v427_v18 }
  0xfc   :  { %v943_v15 = vsel %vm934_vm3, %v1118_v54, 1.0  ;;  %v1835_v46 = vpop.eup %1119 }
  0xfd   :  { %v957_v17 = vmul.f32 %v941_v0, %v897_v47  ;;  %v437_v0 = vmul.f32 %v1817_v61, %v436_v44 }
  0xfe   :  { %v769_v27 = vpop.f32.mrf.mxu2  ;;  %v1857_v57 = vpop.xlane.xlu2 %295 }
  0xff   :  { %v977_v10 = vadd.f32 %v1716_v49, %v957_v17  ;;  %v770_v25 = vadd.f32 %v769_v27, %v705_v12  ;;  %v707_v62 = vpop.f32.mrf.mxu1  ;;  %v1838_v12 = vpop.xlane.xlu1 %289  ;;  %v421_v17 = vand.u32 2147483648, %v1762_v6  ;;  %vm478_vm14 = vcmp.eq.f32.partialorder %v1857_v57, inf }
 0x100   :  { %v834_v30 = vpop.f32.mrf.mxu3  ;;  %v708_v56 = vadd.f32 %v707_v62, %v1639_v4  ;;  %v1122_v27 = vpop.eup %1121  ;;  %1123 = vrsqrt.f32 %v1838_v12  ;;  %v429_v62 = vmul.f32 %v428_v58, %v1777_v21  ;;  %vm466_vm12 = vcmp.eq.f32.partialorder %v1838_v12, inf }
 0x101   :  { %993 = vst [vmem:[#allocation7 + $0x20] sm:$0xff] %v977_v10  ;;  %v835_v9 = vadd.f32 %v834_v30, %v770_v25  ;;  %v438_v10 = vmul.f32 0.5, %v437_v0  ;;  %v448_v25 = vmul.f32 %v1835_v46, %v1819_v11  ;;  %1125 = vrcp.f32 %v503_v23 }
 0x102   :  { %v899_v43 = vpop.f32.mrf.mxu0  ;;  %1127 = vrsqrt.f32 %v1857_v57  ;;  %vm468_vm13 = vcmp.eq.f32.partialorder %v1838_v12, 0.0  ;;  %vm480_vm15 = vcmp.eq.f32.partialorder %v1857_v57, 0.0 }
 0x103   :  { %v900_v7 = vadd.f32 %v899_v43, %v835_v9  ;;  %v944_v9 = vsel %vm934_vm3, %v1122_v27, 1.0  ;;  %v439_v43 = vsub.f32 1.5, %v438_v10 }
 0x105   :  { %v958_v31 = vmul.f32 %v942_v20, %v900_v7  ;;  %v449_v20 = vmul.f32 %v1835_v46, %v448_v25  ;;  %v440_v5 = vmul.f32 %v1817_v61, %v439_v43 }
 0x106   :  { %v772_v52 = vpop.f32.mrf.mxu2 }
 0x107   :  { %v978_v48 = vadd.f32 %v1716_v49, %v958_v31  ;;  %v773_v63 = vadd.f32 %v772_v52, %v708_v56  ;;  %v710_v50 = vpop.f32.mrf.mxu1  ;;  %v1860_v56 = vpop.eup %1123  ;;  %v433_v31 = vand.u32 2147483648, %v1777_v21 }
 0x108   :  { %v837_v19 = vpop.f32.mrf.mxu3  ;;  %v711_v35 = vadd.f32 %v710_v50, %v1653_v8  ;;  %v419_v8 = vsel %vm418_vm4, %v1762_v6, %v417_v16  ;;  %v431_v6 = vsel %vm430_vm6, %v1777_v21, %v429_v62  ;;  %v1126_v32 = vpop.eup %1125  ;;  %v460_v50 = vmul.f32 %v1860_v56, %v1838_v12 }
 0x109   :  { %994 = vst [vmem:[#allocation7 + $0x28] sm:$0xff] %v978_v48  ;;  %v838_v4 = vadd.f32 %v837_v19, %v773_v63  ;;  %v422_v60 = vsel %vm420_vm5, %v421_v17, %v419_v8  ;;  %v945_v21 = vsel %vm934_vm3, %v1126_v32, 1.0  ;;  %v434_v44 = vsel %vm432_vm7, %v433_v31, %v431_v6  ;;  %v1876_v18 = vpop.eup %1127 }
 0x10a   :  { %v902_v40 = vpop.f32.mrf.mxu0  ;;  %v504_v14 = vadd.f32 1e-05, %v422_v60  ;;  %v505_v0 = vadd.f32 1e-05, %v434_v44 }
 0x10b   :  { %v903_v2 = vadd.f32 %v902_v40, %v838_v4  ;;  %v441_v4 = vmul.f32 %v440_v5, %v1799_v41  ;;  %v1873_v40 = vpop.xlane.xlu0 %301 }
 0x10c   :  { %1129 = vrcp.f32 %v504_v14  ;;  %vm490_vm0 = vcmp.eq.f32.partialorder %v1873_v40, inf  ;;  %vm492_vm1 = vcmp.eq.f32.partialorder %v1873_v40, 0.0 }
 0x10d   :  { %v959_v47 = vmul.f32 %v943_v15, %v903_v2  ;;  %v461_v2 = vmul.f32 %v1860_v56, %v460_v50  ;;  %1131 = vrsqrt.f32 %v1873_v40 }
 0x10e   :  { %v775_v22 = vpop.f32.mrf.mxu2  ;;  %1133 = vrcp.f32 %v505_v0 }
 0x10f   :  { %v979_v29 = vadd.f32 %v1716_v49, %v959_v47  ;;  %v776_v37 = vadd.f32 %v775_v22, %v711_v35  ;;  %v713_v26 = vpop.f32.mrf.mxu1  ;;  %v445_v35 = vand.u32 2147483648, %v1799_v41 }
 0x110   :  { %v840_v38 = vpop.f32.mrf.mxu3  ;;  %v714_v28 = vadd.f32 %v713_v26, %v1622_v51  ;;  %v450_v51 = vmul.f32 0.5, %v449_v20 }
 0x111   :  { %995 = vst [vmem:[#allocation7 + $0x30] sm:$0xff] %v979_v29  ;;  %v841_v34 = vadd.f32 %v840_v38, %v776_v37  ;;  %v443_v29 = vsel %vm442_vm8, %v1799_v41, %v441_v4  ;;  %v472_v37 = vmul.f32 %v1876_v18, %v1857_v57  ;;  %v462_v38 = vmul.f32 0.5, %v461_v2 }
 0x112   :  { %v905_v30 = vpop.f32.mrf.mxu0  ;;  %v451_v15 = vsub.f32 1.5, %v450_v51  ;;  %v1130_v23 = vpop.eup %1129  ;;  %v446_v25 = vsel %vm444_vm9, %v445_v35, %v443_v29  ;;  %v469_v2 = vand.u32 2147483648, %v1838_v12 }
 0x113   :  { %v906_v42 = vadd.f32 %v905_v30, %v841_v34  ;;  %v946_v8 = vsel %vm934_vm3, %v1130_v23, 1.0  ;;  %v1890_v62 = vpop.eup %1131  ;;  %v473_v41 = vmul.f32 %v1876_v18, %v472_v37 }
 0x114   :  { %v1134_v20 = vpop.eup %1133  ;;  %v484_v32 = vmul.f32 %v1890_v62, %v1873_v40 }
 0x115   :  { %v960_v7 = vmul.f32 %v944_v9, %v906_v42  ;;  %v463_v9 = vsub.f32 1.5, %v462_v38  ;;  %v506_v42 = vadd.f32 1e-05, %v446_v25  ;;  %v474_v6 = vmul.f32 0.5, %v473_v41 }
 0x116   :  { %v778_v36 = vpop.f32.mrf.mxu2  ;;  %v485_v51 = vmul.f32 %v1890_v62, %v484_v32  ;;  %v481_v25 = vand.u32 2147483648, %v1857_v57 }
 0x117   :  { %v980_v52 = vadd.f32 %v1716_v49, %v960_v7  ;;  %v779_v24 = vadd.f32 %v778_v36, %v714_v28  ;;  %v716_v54 = vpop.f32.mrf.mxu1  ;;  %v457_v36 = vand.u32 2147483648, %v1819_v11  ;;  %1135 = vrcp.f32 %v506_v42 }
 0x118   :  { %v843_v48 = vpop.f32.mrf.mxu3  ;;  %v717_v3 = vadd.f32 %v716_v54, %v1634_v33  ;;  %v452_v33 = vmul.f32 %v1835_v46, %v451_v15  ;;  %v947_v54 = vsel %vm934_vm3, %v1134_v20, 1.0  ;;  %v475_v50 = vsub.f32 1.5, %v474_v6 }
 0x119   :  { %996 = vst [vmem:[#allocation7 + $0x38] sm:$0xff] %v980_v52  ;;  %v844_v63 = vadd.f32 %v843_v48, %v779_v24 }
 0x11a   :  { %v908_v19 = vpop.f32.mrf.mxu0  ;;  %v453_v30 = vmul.f32 %v452_v33, %v1819_v11  ;;  %v476_v0 = vmul.f32 %v1876_v18, %v475_v50 }
 0x11b   :  { %v909_v61 = vadd.f32 %v908_v19, %v844_v63 }
 0x11c   :  { %v455_v52 = vsel %vm454_vm10, %v1819_v11, %v453_v30 }
 0x11d   :  { %v961_v16 = vmul.f32 %v945_v21, %v909_v61  ;;  %v458_v63 = vsel %vm456_vm11, %v457_v36, %v455_v52  ;;  %v1136_v4 = vpop.eup %1135  ;;  %v493_v36 = vand.u32 2147483648, %v1873_v40 }
 0x11e   :  { %v781_v47 = vpop.f32.mrf.mxu2 }
 0x11f   :  { %v981_v17 = vadd.f32 %v1716_v49, %v961_v16  ;;  %v782_v58 = vadd.f32 %v781_v47, %v717_v3  ;;  %v719_v22 = vpop.f32.mrf.mxu1  ;;  %v507_v16 = vadd.f32 1e-05, %v458_v63 }
 0x120   :  { %v846_v27 = vpop.f32.mrf.mxu3  ;;  %v720_v46 = vadd.f32 %v719_v22, %v1645_v13  ;;  %v464_v13 = vmul.f32 %v1860_v56, %v463_v9 }
 0x121   :  { %997 = vst [vmem:[#allocation7 + $0x40] sm:$0xff] %v981_v17  ;;  %v847_v26 = vadd.f32 %v846_v27, %v782_v58  ;;  %v948_v17 = vsel %vm934_vm3, %v1136_v4, 1.0  ;;  %1137 = vrcp.f32 %v507_v16  ;;  %v477_v27 = vmul.f32 %v476_v0, %v1857_v57 }
 0x122   :  { %v911_v10 = vpop.f32.mrf.mxu0  ;;  %v465_v19 = vmul.f32 %v464_v13, %v1838_v12 }
 0x123   :  { %v912_v34 = vadd.f32 %v911_v10, %v847_v26  ;;  %v479_v30 = vsel %vm478_vm14, %v1857_v57, %v477_v27 }
 0x124   :  { %v467_v35 = vsel %vm466_vm12, %v1838_v12, %v465_v19  ;;  %v482_v42 = vsel %vm480_vm15, %v481_v25, %v479_v30 }
 0x125   :  { %v962_v60 = vmul.f32 %v946_v8, %v912_v34  ;;  %v470_v22 = vsel %vm468_vm13, %v469_v2, %v467_v35 }
 0x126   :  { %v784_v43 = vpop.f32.mrf.mxu2  ;;  %v508_v8 = vadd.f32 1e-05, %v470_v22 }
 0x127   :  { %v982_v28 = vadd.f32 %v1716_v49, %v962_v60  ;;  %v785_v7 = vadd.f32 %v784_v43, %v720_v46  ;;  %v722_v14 = vpop.f32.mrf.mxu1  ;;  %v1138_v34 = vpop.eup %1137 }
 0x128   :  { %v849_v31 = vpop.f32.mrf.mxu3  ;;  %v723_v21 = vadd.f32 %v722_v14, %v1667_v45  ;;  %v486_v45 = vmul.f32 0.5, %v485_v51  ;;  %1139 = vrcp.f32 %v508_v8  ;;  %v949_v60 = vsel %vm934_vm3, %v1138_v34, 1.0 }
 0x129   :  { %998 = vst [vmem:[#allocation7 + $0x48] sm:$0xff] %v982_v28  ;;  %v850_v5 = vadd.f32 %v849_v31, %v785_v7  ;;  %v509_v31 = vadd.f32 1e-05, %v482_v42 }
 0x12a   :  { %v914_v24 = vpop.f32.mrf.mxu0  ;;  %v487_v29 = vsub.f32 1.5, %v486_v45 }
 0x12b   :  { %v915_v48 = vadd.f32 %v914_v24, %v850_v5  ;;  %1141 = vrcp.f32 %v509_v31 }
 0x12c   :  { %v488_v41 = vmul.f32 %v1890_v62, %v487_v29 }
 0x12d   :  { %v963_v44 = vmul.f32 %v947_v54, %v915_v48 }
 0x12e   :  { %v787_v56 = vpop.f32.mrf.mxu2  ;;  %v489_v43 = vmul.f32 %v488_v41, %v1873_v40  ;;  %v1140_v32 = vpop.eup %1139 }
 0x12f   :  { %v983_v11 = vadd.f32 %v1716_v49, %v963_v44  ;;  %v788_v61 = vadd.f32 %v787_v56, %v723_v21  ;;  %v725_v15 = vpop.f32.mrf.mxu1  ;;  %v950_v24 = vsel %vm934_vm3, %v1140_v32, 1.0 }
 0x130   :  { %v852_v3 = vpop.f32.mrf.mxu3  ;;  %v726_v33 = vadd.f32 %v725_v15, %v1624_v55  ;;  %v491_v52 = vsel %vm490_vm0, %v1873_v40, %v489_v43 }
 0x131   :  { %999 = vst [vmem:[#allocation7 + $0x50] sm:$0xff] %v983_v11  ;;  %v853_v47 = vadd.f32 %v852_v3, %v788_v61  ;;  %v494_v54 = vsel %vm492_vm1, %v493_v36, %v491_v52  ;;  %v1142_v56 = vpop.eup %1141 }
 0x132   :  { %v917_v23 = vpop.f32.mrf.mxu0  ;;  %v510_v44 = vadd.f32 1e-05, %v494_v54  ;;  %v951_v15 = vsel %vm934_vm3, %v1142_v56, 1.0 }
 0x133   :  { %v918_v58 = vadd.f32 %v917_v23, %v853_v47 }
 0x134   :  { %1143 = vrcp.f32 %v510_v44 }
 0x135   :  { %v964_v37 = vmul.f32 %v948_v17, %v918_v58 }
 0x136   :  { %v790_v18 = vpop.f32.mrf.mxu2 }
 0x137   :  { %v984_v12 = vadd.f32 %v1716_v49, %v964_v37  ;;  %v791_v26 = vadd.f32 %v790_v18, %v726_v33  ;;  %v728_v38 = vpop.f32.mrf.mxu1 }
 0x138   :  { %v855_v10 = vpop.f32.mrf.mxu3  ;;  %v729_v20 = vadd.f32 %v728_v38, %v1637_v1 }
 0x139   :  { %1000 = vst [vmem:[#allocation7 + $0x58] sm:$0xff] %v984_v12  ;;  %v856_v55 = vadd.f32 %v855_v10, %v791_v26 }
 0x13a   :  { %v920_v46 = vpop.f32.mrf.mxu0  ;;  %v1144_v45 = vpop.eup %1143 }
 0x13b   :  { %v921_v9 = vadd.f32 %v920_v46, %v856_v55  ;;  %v952_v58 = vsel %vm934_vm3, %v1144_v45, 1.0 }
 0x13d   :  { %v965_v28 = vmul.f32 %v949_v60, %v921_v9 }
 0x13e   :  { %v793_v7 = vpop.f32.mrf.mxu2 }
 0x13f   :  { %v985_v57 = vadd.f32 %v1716_v49, %v965_v28  ;;  %v794_v62 = vadd.f32 %v793_v7, %v729_v20  ;;  %v731_v6 = vpop.f32.mrf.mxu1 }
 0x140   :  { %v858_v14 = vpop.f32.mrf.mxu3  ;;  %v732_v48 = vadd.f32 %v731_v6, %v1649_v53 }
 0x141   :  { %1001 = vst [vmem:[#allocation7 + $0x60] sm:$0xff] %v985_v57  ;;  %v859_v13 = vadd.f32 %v858_v14, %v794_v62 }
 0x142   :  { %v923_v1 = vpop.f32.mrf.mxu0 }
 0x143   :  { %v924_v5 = vadd.f32 %v923_v1, %v859_v13 }
 0x145   :  { %v966_v51 = vmul.f32 %v950_v24, %v924_v5 }
 0x146   :  { %v796_v63 = vpop.f32.mrf.mxu2 }
 0x147   :  { %v986_v50 = vadd.f32 %v1716_v49, %v966_v51  ;;  %v797_v19 = vadd.f32 %v796_v63, %v732_v48  ;;  %v734_v4 = vpop.f32.mrf.mxu1 }
 0x148   :  { %v861_v21 = vpop.f32.mrf.mxu3  ;;  %v735_v3 = vadd.f32 %v734_v4, %v1671_v39 }
 0x149   :  { %1002 = vst [vmem:[#allocation7 + $0x68] sm:$0xff] %v986_v50  ;;  %v862_v40 = vadd.f32 %v861_v21, %v797_v19 }
 0x14a   :  { %v926_v11 = vpop.f32.mrf.mxu0 }
 0x14b   :  { %v927_v61 = vadd.f32 %v926_v11, %v862_v40 }
 0x14d   :  { %v967_v53 = vmul.f32 %v951_v15, %v927_v61 }
 0x14e   :  { %v799_v16 = vpop.f32.mrf.mxu2 }
 0x14f   :  { %v987_v2 = vadd.f32 %v1716_v49, %v967_v53  ;;  %v800_v0 = vadd.f32 %v799_v16, %v735_v3 }
 0x150   :  { %v864_v35 = vpop.f32.mrf.mxu3 }
 0x151   :  { %1003 = vst [vmem:[#allocation7 + $0x70] sm:$0xff] %v987_v2  ;;  %v865_v47 = vadd.f32 %v864_v35, %v800_v0 }
 0x152   :  { %v929_v23 = vpop.f32.mrf.mxu0 }
 0x153   :  { %v930_v17 = vadd.f32 %v929_v23, %v865_v47 }
 0x155   :  { %v968_v39 = vmul.f32 %v952_v58, %v930_v17 }
 0x157   :  { %v988_v22 = vadd.f32 %v1716_v49, %v968_v39 }
 0x159   :  { %1004 = vst [vmem:[#allocation7 + $0x78] sm:$0xff] %v988_v22 }
 0x15a   :  { %1017 = dma.vmem_to_hbm [thread:$0]  %s1010_s26, 2048, %s1012_s29, [#allocation4], %s1227_s24, %s1227_s24, %s1228_s25  }
 0x15b   :  { %1221 = dma.done.wait [#allocation4], 2048  }
 0x15c   :  { %1222 = vsyncadd [#allocation4], 4294965248 }
 0x15d   :  { %1022 = vsyncpa [#allocation3], 1 }
 0x15e   :  { %1023 = vsyncpa [#allocation6], 1 }
 0x15f   :  { %1024 = vsyncpa [#allocation4], 1 }

</bundles_post_ra>
